<compile_context>
chip_gen: v6e
topology: v6e:2x2x1
jax: 0.10.0
libtpu: 0.0.40
codegen_flags: <defaults>
</compile_context>

<pallas_src>
import jax
import jax.numpy as jnp
import numpy as np
from jax.experimental import pallas as pl
from jax.experimental.pallas import tpu as pltpu


def node_block_kernel(onehot_ref, nodes_ref, edges_ref,
                      wn_ref, we_ref, ba_ref,
                      wb_ref, bb_ref,
                      wc_ref, bc_ref,
                      out_ref):
    # edges_ref : (E, b_blk*C)   lane-folded batch, columns ordered (b, c)
    # nodes_ref : (N, b_blk*nin) columns ordered (b, f)
    # onehot_ref: (N, E)         one-hot * 1/count (batch-invariant)
    # weights   : block-diagonal kron(I_b, 30*W) built in the wrapper
    # out_ref   : (N, b_blk*nout)

    # ---- project edge features to hidden (per-batch via block-diag weight) ----
    ep = jnp.dot(edges_ref[...], we_ref[...],
                 preferred_element_type=jnp.float32)           # (E, b_blk*H)

    # ---- batched scatter-mean: ONE (N,E)@(E,b_blk*H) matmul ----
    agg = jnp.dot(onehot_ref[...], ep,
                  preferred_element_type=jnp.float32)          # (N, b_blk*H)

    # ---- siren MLP (omega=30 already folded into weights/biases) ----
    h = (jnp.dot(nodes_ref[...], wn_ref[...],
                 preferred_element_type=jnp.float32) + agg + ba_ref[...])
    h = jnp.sin(h)
    h = jnp.dot(h, wb_ref[...], preferred_element_type=jnp.float32) + bb_ref[...]
    h = jnp.sin(h)
    out = jnp.dot(h, wc_ref[...], preferred_element_type=jnp.float32) + bc_ref[...]
    out_ref[...] = out.astype(out_ref.dtype)                   # (N, b_blk*nout)


def _pad_f32_bytes(r, c):
    """f32 VMEM footprint of an (r, c) tile padded to the (8,128) native tiling."""
    return ((r + 7) // 8 * 8) * ((c + 127) // 128 * 128) * 4


def _vmem_estimate(b, N, E, nin, C, H, nout):
    consts = (_pad_f32_bytes(N, E)
              + _pad_f32_bytes(b * nin, b * H) + _pad_f32_bytes(b * C, b * H)
              + _pad_f32_bytes(b * H, b * H) + _pad_f32_bytes(b * H, b * nout)
              + 2 * _pad_f32_bytes(1, b * H) + _pad_f32_bytes(1, b * nout))
    blocks = (_pad_f32_bytes(N, b * nin) + _pad_f32_bytes(E, b * C)
              + _pad_f32_bytes(N, b * nout))
    work = _pad_f32_bytes(E, b * H) + 3 * _pad_f32_bytes(N, b * H)
    # consts counted double-buffered (worst case / fallback path), pipelined
    # blocks double-buffered, plus in-kernel working set.
    return 2 * consts + 2 * blocks + work


def _pick_b_blk(B, N, E, nin, C, H, nout, row_cap=512, vmem_cap=48 * 2**20):
    """Largest divisor of B with <=row_cap node-rows/step, >=2 grid steps
    (keeps both v7x TensorCores busy on the 'parallel' axis) and a padded
    VMEM estimate under the v7x budget."""
    best = 1
    for d in range(1, B + 1):
        if B % d:
            continue
        if d * N > row_cap:
            continue
        if B >= 2 and B // d < 2:
            continue
        if _vmem_estimate(d, N, E, nin, C, H, nout) > vmem_cap:
            continue
        best = d
    return best


def node_block(nodes, edges, receivers, params, *, b_blk=None):
    """nodes: [B,N,nin] f32, edges: [B,E,C] f32, receivers: [E] int32.

    Note: out-of-range receiver indices are silently dropped (consistent with
    the segment_sum reference, different from PyTorch scatter semantics)."""
    B, N, nin = nodes.shape
    _, E, C = edges.shape
    wa_n, wa_e, ba, wb, bb, wc, bc = params
    H = wa_n.shape[1]
    nout = wc.shape[1]

    if b_blk is None:
        b_blk = _pick_b_blk(B, N, E, nin, C, H, nout)
    assert B % b_blk == 0, "b_blk must divide the batch size"
    G = B // b_blk

    # ---- batch-invariant scatter machinery, hoisted out of the grid loop ----
    node_ids = jnp.arange(N, dtype=jnp.int32)[:, None]                      # (N,1)
    onehot = (node_ids == receivers[None, :].astype(jnp.int32)).astype(jnp.float32)
    counts = jnp.sum(onehot, axis=1, keepdims=True)                          # (N,1)
    onehot_s = onehot / jnp.maximum(counts, 1.0)     # 1/count folded into rows

    # ---- fold omega=30 into layers A/B; block-diagonalize for per-batch lanes ----
    eye_b = jnp.eye(b_blk, dtype=jnp.float32)
    wn_b = jnp.kron(eye_b, 30.0 * wa_n)              # (b*nin,  b*H)
    we_b = jnp.kron(eye_b, 30.0 * wa_e)              # (b*C,    b*H)
    wb_b = jnp.kron(eye_b, 30.0 * wb)                # (b*H,    b*H)
    wc_b = jnp.kron(eye_b, wc)                       # (b*H,    b*nout)
    ba_b = jnp.tile(30.0 * ba, b_blk).reshape(1, b_blk * H)
    bb_b = jnp.tile(30.0 * bb, b_blk).reshape(1, b_blk * H)
    bc_b = jnp.tile(bc, b_blk).reshape(1, b_blk * nout)
    consts = (wn_b, we_b, ba_b, wb_b, bb_b, wc_b, bc_b)

    # ---- lane-folded batch layout (wrapper-side layout plumbing only) ----
    nodes_g = (nodes.reshape(G, b_blk, N, nin).transpose(0, 2, 1, 3)
               .reshape(G, N, b_blk * nin))
    edges_g = (edges.reshape(G, b_blk, E, C).transpose(0, 2, 1, 3)
               .reshape(G, E, b_blk * C))

    vmem_limit = int(min(56 * 2**20,
                         max(32 * 2**20,
                             2 * _vmem_estimate(b_blk, N, E, nin, C, H, nout))))

    def run(const_buffer_count):
        spec_kw = ({} if const_buffer_count is None
                   else {"pipeline_mode": pl.Buffered(const_buffer_count)})

        def const_spec(arr):
            return pl.BlockSpec(arr.shape, lambda i: (0,) * arr.ndim, **spec_kw)

        grid_spec = pltpu.PrefetchScalarGridSpec(
            num_scalar_prefetch=0,
            grid=(G,),
            in_specs=[
                const_spec(onehot_s),                                    # (N, E)
                pl.BlockSpec((None, N, b_blk * nin), lambda i: (i, 0, 0)),
                pl.BlockSpec((None, E, b_blk * C), lambda i: (i, 0, 0)),
            ] + [const_spec(c) for c in consts],
            out_specs=pl.BlockSpec((None, N, b_blk * nout), lambda i: (i, 0, 0)),
        )
        return pl.pallas_call(
            node_block_kernel,
            out_shape=jax.ShapeDtypeStruct((G, N, b_blk * nout), nodes.dtype),
            grid_spec=grid_spec,
            compiler_params=pltpu.CompilerParams(
                dimension_semantics=("parallel",),
                vmem_limit_bytes=vmem_limit),
        )(onehot_s, nodes_g, edges_g, *consts)

    try:
        out_g = run(1)       # single-buffer the batch-invariant inputs
    except Exception:
        out_g = run(None)    # fallback: default double buffering if Buffered(1) unsupported

    # unfold the lane-folded batch back to (B, N, nout)
    return (out_g.reshape(G, N, b_blk, nout).transpose(0, 2, 1, 3)
            .reshape(B, N, nout))


def init_params(key, nin, noutPrev, nout, hidden):
    """Deterministic init mirroring SineLayer / siren init ranges.
    Weights stored pre-transposed as [in, out] so the math is x @ W + b."""
    d_in = nin + noutPrev
    k = jax.random.split(key, 7)
    wa = jax.random.uniform(k[0], (d_in, hidden), jnp.float32,
                            -1.0 / d_in, 1.0 / d_in)
    ba = jax.random.uniform(k[1], (hidden,), jnp.float32,
                            -1.0 / np.sqrt(d_in), 1.0 / np.sqrt(d_in))
    lim_b = np.sqrt(6.0 / hidden) / 30.0
    wb = jax.random.uniform(k[2], (hidden, hidden), jnp.float32, -lim_b, lim_b)
    bb = jax.random.uniform(k[3], (hidden,), jnp.float32,
                            -1.0 / np.sqrt(hidden), 1.0 / np.sqrt(hidden))
    wc = jax.random.uniform(k[4], (hidden, nout), jnp.float32, -lim_b, lim_b)
    bc = jax.random.uniform(k[5], (nout,), jnp.float32,
                            -1.0 / np.sqrt(hidden), 1.0 / np.sqrt(hidden))
    # split W_A into node / aggregated-edge parts (the concat folds into matmuls)
    wa_n, wa_e = wa[:nin], wa[nin:]
    return (wa_n, wa_e, ba, wb, bb, wc, bc)


def reference(nodes, edges, receivers, params):
    """Pure-JAX reference of nodeBlock.forward for validation."""
    wa_n, wa_e, ba, wb, bb, wc, bc = params
    B, N, _ = nodes.shape
    seg_sum = jax.vmap(
        lambda e: jax.ops.segment_sum(e, receivers, num_segments=N))(edges)
    counts = jax.ops.segment_sum(jnp.ones_like(receivers, jnp.float32),
                                 receivers, num_segments=N)
    agg = seg_sum / jnp.maximum(counts, 1.0)[None, :, None]
    h = jnp.sin(30.0 * (nodes @ wa_n + agg @ wa_e + ba))
    h = jnp.sin(30.0 * (h @ wb + bb))
    return h @ wc + bc


if __name__ == "__main__":
    # Small shapes consistent with nodeBlock(nin, noutPrev, nout, hidden_dim)
    B, N, E = 4, 16, 32
    nin, noutPrev, nout, hidden = 4, 4, 4, 32

    key = jax.random.PRNGKey(0)
    k_nodes, k_edges, k_recv, k_params = jax.random.split(key, 4)

    nodes = jax.random.normal(k_nodes, (B, N, nin), jnp.float32)
    edges = jax.random.normal(k_edges, (B, E, noutPrev), jnp.float32)
    receivers = jax.random.randint(k_recv, (E,), 0, N, jnp.int32)
    params = init_params(k_params, nin, noutPrev, nout, hidden)

    # auto heuristic picks b_blk=2 -> grid=(2,): batch blocking + multi-step grid.
    out = node_block(nodes, edges, receivers, params)
    out = jax.block_until_ready(out)

    ref = reference(nodes, edges, receivers, params)
    np.testing.assert_allclose(np.asarray(out), np.asarray(ref), rtol=1e-4, atol=1e-4)

    print("KERNEL_OK")
</pallas_src>

<mosaic_0001>
module attributes {stable_mosaic.version = 11 : i64} {
  func.func @node_block_kernel(%arg0: i32, %arg1: memref<16x32xf32, #tpu.memory_space<vmem>>, %arg2: memref<1x16x8xf32, #tpu.memory_space<vmem>>, %arg3: memref<1x32x8xf32, #tpu.memory_space<vmem>>, %arg4: memref<8x64xf32, #tpu.memory_space<vmem>>, %arg5: memref<8x64xf32, #tpu.memory_space<vmem>>, %arg6: memref<1x64xf32, #tpu.memory_space<vmem>>, %arg7: memref<64x64xf32, #tpu.memory_space<vmem>>, %arg8: memref<1x64xf32, #tpu.memory_space<vmem>>, %arg9: memref<64x8xf32, #tpu.memory_space<vmem>>, %arg10: memref<1x8xf32, #tpu.memory_space<vmem>>, %arg11: memref<1x16x8xf32, #tpu.memory_space<vmem>>) attributes {dimension_semantics = [#tpu.dimension_semantics<parallel>], iteration_bounds = array<i64: 2>, scalar_prefetch = 0 : i64, scratch_operands = 0 : i64, tpu.core_type = #tpu.core_type<tc>, window_params = [{pipeline_mode = #tpu.pipeline_mode<synchronous>, transform_indices = @transform_0, window_bounds = array<i64: 16, 32>}, {transform_indices = @transform_1, window_bounds = array<i64: 1, 16, 8>}, {transform_indices = @transform_2, window_bounds = array<i64: 1, 32, 8>}, {pipeline_mode = #tpu.pipeline_mode<synchronous>, transform_indices = @transform_3, window_bounds = array<i64: 8, 64>}, {pipeline_mode = #tpu.pipeline_mode<synchronous>, transform_indices = @transform_4, window_bounds = array<i64: 8, 64>}, {pipeline_mode = #tpu.pipeline_mode<synchronous>, transform_indices = @transform_5, window_bounds = array<i64: 1, 64>}, {pipeline_mode = #tpu.pipeline_mode<synchronous>, transform_indices = @transform_6, window_bounds = array<i64: 64, 64>}, {pipeline_mode = #tpu.pipeline_mode<synchronous>, transform_indices = @transform_7, window_bounds = array<i64: 1, 64>}, {pipeline_mode = #tpu.pipeline_mode<synchronous>, transform_indices = @transform_8, window_bounds = array<i64: 64, 8>}, {pipeline_mode = #tpu.pipeline_mode<synchronous>, transform_indices = @transform_9, window_bounds = array<i64: 1, 8>}, {transform_indices = @transform_10, window_bounds = array<i64: 1, 16, 8>}]} {
    %c0 = arith.constant 0 : index
    %c0_0 = arith.constant 0 : index
    %c0_1 = arith.constant 0 : index
    %0 = vector.load %arg3[%c0, %c0_0, %c0_1] : memref<1x32x8xf32, #tpu.memory_space<vmem>>, vector<1x32x8xf32>
    %1 = vector.shape_cast %0 : vector<1x32x8xf32> to vector<32x8xf32>
    %c0_2 = arith.constant 0 : index
    %c0_3 = arith.constant 0 : index
    %2 = vector.load %arg5[%c0_2, %c0_3] : memref<8x64xf32, #tpu.memory_space<vmem>>, vector<8x64xf32>
    %cst = arith.constant dense<0.000000e+00> : vector<32x64xf32>
    %3 = tpu.matmul %1, %2, %cst {dimension_numbers = #tpu.dot_dimension_numbers<[1], [0], [0], [1], [0, 0, 1, 1], [], []>} : vector<32x8xf32>, vector<8x64xf32>, vector<32x64xf32> -> vector<32x64xf32>
    %c0_4 = arith.constant 0 : index
    %c0_5 = arith.constant 0 : index
    %4 = vector.load %arg1[%c0_4, %c0_5] : memref<16x32xf32, #tpu.memory_space<vmem>>, vector<16x32xf32>
    %cst_6 = arith.constant dense<0.000000e+00> : vector<16x64xf32>
    %5 = tpu.matmul %4, %3, %cst_6 {dimension_numbers = #tpu.dot_dimension_numbers<[1], [0], [0], [1], [0, 0, 1, 1], [], []>} : vector<16x32xf32>, vector<32x64xf32>, vector<16x64xf32> -> vector<16x64xf32>
    %c0_7 = arith.constant 0 : index
    %c0_8 = arith.constant 0 : index
    %c0_9 = arith.constant 0 : index
    %6 = vector.load %arg2[%c0_7, %c0_8, %c0_9] : memref<1x16x8xf32, #tpu.memory_space<vmem>>, vector<1x16x8xf32>
    %7 = vector.shape_cast %6 : vector<1x16x8xf32> to vector<16x8xf32>
    %c0_10 = arith.constant 0 : index
    %c0_11 = arith.constant 0 : index
    %8 = vector.load %arg4[%c0_10, %c0_11] : memref<8x64xf32, #tpu.memory_space<vmem>>, vector<8x64xf32>
    %cst_12 = arith.constant dense<0.000000e+00> : vector<16x64xf32>
    %9 = tpu.matmul %7, %8, %cst_12 {dimension_numbers = #tpu.dot_dimension_numbers<[1], [0], [0], [1], [0, 0, 1, 1], [], []>} : vector<16x8xf32>, vector<8x64xf32>, vector<16x64xf32> -> vector<16x64xf32>
    %10 = arith.addf %9, %5 : vector<16x64xf32>
    %c0_13 = arith.constant 0 : index
    %c0_14 = arith.constant 0 : index
    %11 = vector.load %arg6[%c0_13, %c0_14] : memref<1x64xf32, #tpu.memory_space<vmem>>, vector<1x64xf32>
    %12 = vector.broadcast %11 : vector<1x64xf32> to vector<16x64xf32>
    %13 = arith.addf %10, %12 : vector<16x64xf32>
    %14 = math.sin %13 : vector<16x64xf32>
    %c0_15 = arith.constant 0 : index
    %c0_16 = arith.constant 0 : index
    %15 = vector.load %arg7[%c0_15, %c0_16] : memref<64x64xf32, #tpu.memory_space<vmem>>, vector<64x64xf32>
    %cst_17 = arith.constant dense<0.000000e+00> : vector<16x64xf32>
    %16 = tpu.matmul %14, %15, %cst_17 {dimension_numbers = #tpu.dot_dimension_numbers<[1], [0], [0], [1], [0, 0, 1, 1], [], []>} : vector<16x64xf32>, vector<64x64xf32>, vector<16x64xf32> -> vector<16x64xf32>
    %c0_18 = arith.constant 0 : index
    %c0_19 = arith.constant 0 : index
    %17 = vector.load %arg8[%c0_18, %c0_19] : memref<1x64xf32, #tpu.memory_space<vmem>>, vector<1x64xf32>
    %18 = vector.broadcast %17 : vector<1x64xf32> to vector<16x64xf32>
    %19 = arith.addf %16, %18 : vector<16x64xf32>
    %20 = math.sin %19 : vector<16x64xf32>
    %c0_20 = arith.constant 0 : index
    %c0_21 = arith.constant 0 : index
    %21 = vector.load %arg9[%c0_20, %c0_21] : memref<64x8xf32, #tpu.memory_space<vmem>>, vector<64x8xf32>
    %cst_22 = arith.constant dense<0.000000e+00> : vector<16x8xf32>
    %22 = tpu.matmul %20, %21, %cst_22 {dimension_numbers = #tpu.dot_dimension_numbers<[1], [0], [0], [1], [0, 0, 1, 1], [], []>} : vector<16x64xf32>, vector<64x8xf32>, vector<16x8xf32> -> vector<16x8xf32>
    %c0_23 = arith.constant 0 : index
    %c0_24 = arith.constant 0 : index
    %23 = vector.load %arg10[%c0_23, %c0_24] : memref<1x8xf32, #tpu.memory_space<vmem>>, vector<1x8xf32>
    %24 = vector.broadcast %23 : vector<1x8xf32> to vector<16x8xf32>
    %25 = arith.addf %22, %24 : vector<16x8xf32>
    %c0_25 = arith.constant 0 : index
    %c0_26 = arith.constant 0 : index
    %c0_27 = arith.constant 0 : index
    %26 = vector.load %arg11[%c0_25, %c0_26, %c0_27] : memref<1x16x8xf32, #tpu.memory_space<vmem>>, vector<1x16x8xf32>
    %27 = vector.shape_cast %26 : vector<1x16x8xf32> to vector<16x8xf32>
    %28 = vector.shape_cast %25 : vector<16x8xf32> to vector<1x16x8xf32>
    tpu.vector_store %arg11[%c0_25, %c0_26, %c0_27], %28 {strides = array<i32>} : memref<1x16x8xf32, #tpu.memory_space<vmem>>, vector<1x16x8xf32>,
    return
  }
  func.func @transform_0(%arg0: i32) -> (i32, i32) {
    %c0_i32 = arith.constant 0 : i32
    %c0_i32_0 = arith.constant 0 : i32
    %c0_i32_1 = arith.constant 0 : i32
    return %c0_i32, %c0_i32_0 : i32, i32
  }
  func.func @transform_1(%arg0: i32) -> (i32, i32, i32) {
    %c0_i32 = arith.constant 0 : i32
    %c0_i32_0 = arith.constant 0 : i32
    %c0_i32_1 = arith.constant 0 : i32
    return %arg0, %c0_i32, %c0_i32_0 : i32, i32, i32
  }
  func.func @transform_2(%arg0: i32) -> (i32, i32, i32) {
    %c0_i32 = arith.constant 0 : i32
    %c0_i32_0 = arith.constant 0 : i32
    %c0_i32_1 = arith.constant 0 : i32
    return %arg0, %c0_i32, %c0_i32_0 : i32, i32, i32
  }
  func.func @transform_3(%arg0: i32) -> (i32, i32) {
    %c0_i32 = arith.constant 0 : i32
    %c0_i32_0 = arith.constant 0 : i32
    %c0_i32_1 = arith.constant 0 : i32
    return %c0_i32, %c0_i32_0 : i32, i32
  }
  func.func @transform_4(%arg0: i32) -> (i32, i32) {
    %c0_i32 = arith.constant 0 : i32
    %c0_i32_0 = arith.constant 0 : i32
    %c0_i32_1 = arith.constant 0 : i32
    return %c0_i32, %c0_i32_0 : i32, i32
  }
  func.func @transform_5(%arg0: i32) -> (i32, i32) {
    %c0_i32 = arith.constant 0 : i32
    %c0_i32_0 = arith.constant 0 : i32
    %c0_i32_1 = arith.constant 0 : i32
    return %c0_i32, %c0_i32_0 : i32, i32
  }
  func.func @transform_6(%arg0: i32) -> (i32, i32) {
    %c0_i32 = arith.constant 0 : i32
    %c0_i32_0 = arith.constant 0 : i32
    %c0_i32_1 = arith.constant 0 : i32
    return %c0_i32, %c0_i32_0 : i32, i32
  }
  func.func @transform_7(%arg0: i32) -> (i32, i32) {
    %c0_i32 = arith.constant 0 : i32
    %c0_i32_0 = arith.constant 0 : i32
    %c0_i32_1 = arith.constant 0 : i32
    return %c0_i32, %c0_i32_0 : i32, i32
  }
  func.func @transform_8(%arg0: i32) -> (i32, i32) {
    %c0_i32 = arith.constant 0 : i32
    %c0_i32_0 = arith.constant 0 : i32
    %c0_i32_1 = arith.constant 0 : i32
    return %c0_i32, %c0_i32_0 : i32, i32
  }
  func.func @transform_9(%arg0: i32) -> (i32, i32) {
    %c0_i32 = arith.constant 0 : i32
    %c0_i32_0 = arith.constant 0 : i32
    %c0_i32_1 = arith.constant 0 : i32
    return %c0_i32, %c0_i32_0 : i32, i32
  }
  func.func @transform_10(%arg0: i32) -> (i32, i32, i32) {
    %c0_i32 = arith.constant 0 : i32
    %c0_i32_0 = arith.constant 0 : i32
    %c0_i32_1 = arith.constant 0 : i32
    return %arg0, %c0_i32, %c0_i32_0 : i32, i32, i32
  }
}

module attributes {stable_mosaic.version = 11 : i64} {
  func.func @node_block_kernel(%arg0: i32, %arg1: memref<16x32xf32, #tpu.memory_space<vmem>>, %arg2: memref<1x16x8xf32, #tpu.memory_space<vmem>>, %arg3: memref<1x32x8xf32, #tpu.memory_space<vmem>>, %arg4: memref<8x64xf32, #tpu.memory_space<vmem>>, %arg5: memref<8x64xf32, #tpu.memory_space<vmem>>, %arg6: memref<1x64xf32, #tpu.memory_space<vmem>>, %arg7: memref<64x64xf32, #tpu.memory_space<vmem>>, %arg8: memref<1x64xf32, #tpu.memory_space<vmem>>, %arg9: memref<64x8xf32, #tpu.memory_space<vmem>>, %arg10: memref<1x8xf32, #tpu.memory_space<vmem>>, %arg11: memref<1x16x8xf32, #tpu.memory_space<vmem>>) attributes {dimension_semantics = [#tpu.dimension_semantics<parallel>], iteration_bounds = array<i64: 2>, scalar_prefetch = 0 : i64, scratch_operands = 0 : i64, tpu.core_type = #tpu.core_type<tc>, window_params = [{pipeline_mode = #tpu.pipeline_mode<synchronous>, transform_indices = @transform_0, window_bounds = array<i64: 16, 32>}, {transform_indices = @transform_1, window_bounds = array<i64: 1, 16, 8>}, {transform_indices = @transform_2, window_bounds = array<i64: 1, 32, 8>}, {pipeline_mode = #tpu.pipeline_mode<synchronous>, transform_indices = @transform_3, window_bounds = array<i64: 8, 64>}, {pipeline_mode = #tpu.pipeline_mode<synchronous>, transform_indices = @transform_4, window_bounds = array<i64: 8, 64>}, {pipeline_mode = #tpu.pipeline_mode<synchronous>, transform_indices = @transform_5, window_bounds = array<i64: 1, 64>}, {pipeline_mode = #tpu.pipeline_mode<synchronous>, transform_indices = @transform_6, window_bounds = array<i64: 64, 64>}, {pipeline_mode = #tpu.pipeline_mode<synchronous>, transform_indices = @transform_7, window_bounds = array<i64: 1, 64>}, {pipeline_mode = #tpu.pipeline_mode<synchronous>, transform_indices = @transform_8, window_bounds = array<i64: 64, 8>}, {pipeline_mode = #tpu.pipeline_mode<synchronous>, transform_indices = @transform_9, window_bounds = array<i64: 1, 8>}, {transform_indices = @transform_10, window_bounds = array<i64: 1, 16, 8>}]} {
    %c0 = arith.constant 0 : index
    %c0_0 = arith.constant 0 : index
    %c0_1 = arith.constant 0 : index
    %0 = vector.load %arg3[%c0, %c0_0, %c0_1] : memref<1x32x8xf32, #tpu.memory_space<vmem>>, vector<1x32x8xf32>
    %1 = vector.shape_cast %0 : vector<1x32x8xf32> to vector<32x8xf32>
    %c0_2 = arith.constant 0 : index
    %c0_3 = arith.constant 0 : index
    %2 = vector.load %arg5[%c0_2, %c0_3] : memref<8x64xf32, #tpu.memory_space<vmem>>, vector<8x64xf32>
    %cst = arith.constant dense<0.000000e+00> : vector<32x64xf32>
    %3 = tpu.matmul %1, %2, %cst {dimension_numbers = #tpu.dot_dimension_numbers<[1], [0], [0], [1], [0, 0, 1, 1], [], []>} : vector<32x8xf32>, vector<8x64xf32>, vector<32x64xf32> -> vector<32x64xf32>
    %c0_4 = arith.constant 0 : index
    %c0_5 = arith.constant 0 : index
    %4 = vector.load %arg1[%c0_4, %c0_5] : memref<16x32xf32, #tpu.memory_space<vmem>>, vector<16x32xf32>
    %cst_6 = arith.constant dense<0.000000e+00> : vector<16x64xf32>
    %5 = tpu.matmul %4, %3, %cst_6 {dimension_numbers = #tpu.dot_dimension_numbers<[1], [0], [0], [1], [0, 0, 1, 1], [], []>} : vector<16x32xf32>, vector<32x64xf32>, vector<16x64xf32> -> vector<16x64xf32>
    %c0_7 = arith.constant 0 : index
    %c0_8 = arith.constant 0 : index
    %c0_9 = arith.constant 0 : index
    %6 = vector.load %arg2[%c0_7, %c0_8, %c0_9] : memref<1x16x8xf32, #tpu.memory_space<vmem>>, vector<1x16x8xf32>
    %7 = vector.shape_cast %6 : vector<1x16x8xf32> to vector<16x8xf32>
    %c0_10 = arith.constant 0 : index
    %c0_11 = arith.constant 0 : index
    %8 = vector.load %arg4[%c0_10, %c0_11] : memref<8x64xf32, #tpu.memory_space<vmem>>, vector<8x64xf32>
    %cst_12 = arith.constant dense<0.000000e+00> : vector<16x64xf32>
    %9 = tpu.matmul %7, %8, %cst_12 {dimension_numbers = #tpu.dot_dimension_numbers<[1], [0], [0], [1], [0, 0, 1, 1], [], []>} : vector<16x8xf32>, vector<8x64xf32>, vector<16x64xf32> -> vector<16x64xf32>
    %10 = arith.addf %9, %5 : vector<16x64xf32>
    %c0_13 = arith.constant 0 : index
    %c0_14 = arith.constant 0 : index
    %11 = vector.load %arg6[%c0_13, %c0_14] : memref<1x64xf32, #tpu.memory_space<vmem>>, vector<1x64xf32>
    %12 = vector.broadcast %11 : vector<1x64xf32> to vector<16x64xf32>
    %13 = arith.addf %10, %12 : vector<16x64xf32>
    %14 = math.sin %13 : vector<16x64xf32>
    %c0_15 = arith.constant 0 : index
    %c0_16 = arith.constant 0 : index
    %15 = vector.load %arg7[%c0_15, %c0_16] : memref<64x64xf32, #tpu.memory_space<vmem>>, vector<64x64xf32>
    %cst_17 = arith.constant dense<0.000000e+00> : vector<16x64xf32>
    %16 = tpu.matmul %14, %15, %cst_17 {dimension_numbers = #tpu.dot_dimension_numbers<[1], [0], [0], [1], [0, 0, 1, 1], [], []>} : vector<16x64xf32>, vector<64x64xf32>, vector<16x64xf32> -> vector<16x64xf32>
    %c0_18 = arith.constant 0 : index
    %c0_19 = arith.constant 0 : index
    %17 = vector.load %arg8[%c0_18, %c0_19] : memref<1x64xf32, #tpu.memory_space<vmem>>, vector<1x64xf32>
    %18 = vector.broadcast %17 : vector<1x64xf32> to vector<16x64xf32>
    %19 = arith.addf %16, %18 : vector<16x64xf32>
    %20 = math.sin %19 : vector<16x64xf32>
    %c0_20 = arith.constant 0 : index
    %c0_21 = arith.constant 0 : index
    %21 = vector.load %arg9[%c0_20, %c0_21] : memref<64x8xf32, #tpu.memory_space<vmem>>, vector<64x8xf32>
    %cst_22 = arith.constant dense<0.000000e+00> : vector<16x8xf32>
    %22 = tpu.matmul %20, %21, %cst_22 {dimension_numbers = #tpu.dot_dimension_numbers<[1], [0], [0], [1], [0, 0, 1, 1], [], []>} : vector<16x64xf32>, vector<64x8xf32>, vector<16x8xf32> -> vector<16x8xf32>
    %c0_23 = arith.constant 0 : index
    %c0_24 = arith.constant 0 : index
    %23 = vector.load %arg10[%c0_23, %c0_24] : memref<1x8xf32, #tpu.memory_space<vmem>>, vector<1x8xf32>
    %24 = vector.broadcast %23 : vector<1x8xf32> to vector<16x8xf32>
    %25 = arith.addf %22, %24 : vector<16x8xf32>
    %c0_25 = arith.constant 0 : index
    %c0_26 = arith.constant 0 : index
    %c0_27 = arith.constant 0 : index
    %26 = vector.load %arg11[%c0_25, %c0_26, %c0_27] : memref<1x16x8xf32, #tpu.memory_space<vmem>>, vector<1x16x8xf32>
    %27 = vector.shape_cast %26 : vector<1x16x8xf32> to vector<16x8xf32>
    %28 = vector.shape_cast %25 : vector<16x8xf32> to vector<1x16x8xf32>
    tpu.vector_store %arg11[%c0_25, %c0_26, %c0_27], %28 {strides = array<i32>} : memref<1x16x8xf32, #tpu.memory_space<vmem>>, vector<1x16x8xf32>,
    return
  }
  func.func @transform_0(%arg0: i32) -> (i32, i32) {
    %c0_i32 = arith.constant 0 : i32
    %c0_i32_0 = arith.constant 0 : i32
    %c0_i32_1 = arith.constant 0 : i32
    return %c0_i32, %c0_i32_0 : i32, i32
  }
  func.func @transform_1(%arg0: i32) -> (i32, i32, i32) {
    %c0_i32 = arith.constant 0 : i32
    %c0_i32_0 = arith.constant 0 : i32
    %c0_i32_1 = arith.constant 0 : i32
    return %arg0, %c0_i32, %c0_i32_0 : i32, i32, i32
  }
  func.func @transform_2(%arg0: i32) -> (i32, i32, i32) {
    %c0_i32 = arith.constant 0 : i32
    %c0_i32_0 = arith.constant 0 : i32
    %c0_i32_1 = arith.constant 0 : i32
    return %arg0, %c0_i32, %c0_i32_0 : i32, i32, i32
  }
  func.func @transform_3(%arg0: i32) -> (i32, i32) {
    %c0_i32 = arith.constant 0 : i32
    %c0_i32_0 = arith.constant 0 : i32
    %c0_i32_1 = arith.constant 0 : i32
    return %c0_i32, %c0_i32_0 : i32, i32
  }
  func.func @transform_4(%arg0: i32) -> (i32, i32) {
    %c0_i32 = arith.constant 0 : i32
    %c0_i32_0 = arith.constant 0 : i32
    %c0_i32_1 = arith.constant 0 : i32
    return %c0_i32, %c0_i32_0 : i32, i32
  }
  func.func @transform_5(%arg0: i32) -> (i32, i32) {
    %c0_i32 = arith.constant 0 : i32
    %c0_i32_0 = arith.constant 0 : i32
    %c0_i32_1 = arith.constant 0 : i32
    return %c0_i32, %c0_i32_0 : i32, i32
  }
  func.func @transform_6(%arg0: i32) -> (i32, i32) {
    %c0_i32 = arith.constant 0 : i32
    %c0_i32_0 = arith.constant 0 : i32
    %c0_i32_1 = arith.constant 0 : i32
    return %c0_i32, %c0_i32_0 : i32, i32
  }
  func.func @transform_7(%arg0: i32) -> (i32, i32) {
    %c0_i32 = arith.constant 0 : i32
    %c0_i32_0 = arith.constant 0 : i32
    %c0_i32_1 = arith.constant 0 : i32
    return %c0_i32, %c0_i32_0 : i32, i32
  }
  func.func @transform_8(%arg0: i32) -> (i32, i32) {
    %c0_i32 = arith.constant 0 : i32
    %c0_i32_0 = arith.constant 0 : i32
    %c0_i32_1 = arith.constant 0 : i32
    return %c0_i32, %c0_i32_0 : i32, i32
  }
  func.func @transform_9(%arg0: i32) -> (i32, i32) {
    %c0_i32 = arith.constant 0 : i32
    %c0_i32_0 = arith.constant 0 : i32
    %c0_i32_1 = arith.constant 0 : i32
    return %c0_i32, %c0_i32_0 : i32, i32
  }
  func.func @transform_10(%arg0: i32) -> (i32, i32, i32) {
    %c0_i32 = arith.constant 0 : i32
    %c0_i32_0 = arith.constant 0 : i32
    %c0_i32_1 = arith.constant 0 : i32
    return %arg0, %c0_i32, %c0_i32_0 : i32, i32, i32
  }
}

</mosaic_0001>

<bundles_post_ra>
// kernel: tpu_custom_call.1
= control target key start
LH: loop header
LB: loop body
LE: loop exit
PB: predicated region body
PF: predicated region fallthrough
CT: control target
= control target key end

     0   :  { %s1596_s13 = smov 0   ;;  %s1906_s0 = inlined_call_operand.vmem [shape: f32[16,32], index: 0, kind: input, shape index: {}]   ;;  %s1907_s1 = inlined_call_operand.vmem [shape: f32[2,16,8], index: 1, kind: input, shape index: {}]   ;;  %s1908_s2 = inlined_call_operand.vmem [shape: f32[2,32,8], index: 2, kind: input, shape index: {}]   ;;  %s1909_s3 = inlined_call_operand.vmem [shape: f32[8,64], index: 3, kind: input, shape index: {}]   ;;  %s1910_s4 = inlined_call_operand.vmem [shape: f32[8,64], index: 4, kind: input, shape index: {}]   ;;  %s1911_s5 = inlined_call_operand.vmem [shape: f32[1,64], index: 5, kind: input, shape index: {}]   ;;  %s1912_s6 = inlined_call_operand.vmem [shape: f32[64,64], index: 6, kind: input, shape index: {}]   ;;  %s1913_s7 = inlined_call_operand.vmem [shape: f32[1,64], index: 7, kind: input, shape index: {}]   ;;  %s1914_s8 = inlined_call_operand.vmem [shape: f32[64,8], index: 8, kind: input, shape index: {}]   ;;  %s1915_s9 = inlined_call_operand.vmem [shape: f32[1,8], index: 9, kind: input, shape index: {}]   ;;  %s1916_s10 = inlined_call_operand.vmem [shape: f32[2,16,8], index: 10, kind: output, shape index: {}]  }
   0x1 LB: > { %s1338_s14 = sadd.s32 4294967295, %s1533_s13   ;;  %p1342_p0 = scmp.ge.s32.totalorder %s1533_s13, 1  ;;  %s1533_s13 = sphi %s1596_s13, %s20_s13  }
   0x2   : > { %p322_p1 = scmp.lt.s32.totalorder %s1533_s13, 3 }
   0x4   : > { %p323_p2 = pnand %p1342_p0, %p322_p1 }
   0x5   : > { %p365_p3 = scmp.lt.s32.totalorder (!%p323_p2), %s1338_s14, 1 }
   0x6   : > { %326 = sbr.rel (%p323_p2) target bundleno = 999 (0x3e7), region = 60 }
   0xb   : > { %v384_v0 = vld [vmem:[%s1910_s4] sm:$0xff]  ;;  %s1922_s14 = smov (!%p365_p3, %s1338_s14), 1  ;;  %vm385_vm0 = vcmask 64512   ;;  %vm485_vm1 = vcmask 261120   ;;  %v484_v13 = vld [vmem:[%s1906_s0 + $0x8] sm:$0xff]  ;;  %v875_v14 = vld [vmem:[%s1912_s6 + $0x38] sm:$0xff] }
   0xc   : > { %1419 = vmatprep.subr.mxu0 %v384_v0  ;;  %s1383_s17 = sshll.u32 %s1922_s14, 5  ;;  %v569_v5 = vld [vmem:[%s1909_s3] sm:$0xff]  ;;  %s1382_s23 = sshll.u32 %s1922_s14, 4  ;;  %v874_v15 = vld [vmem:[%s1912_s6 + $0x30] sm:$0xff]  ;;  %v873_v16 = vld [vmem:[%s1912_s6 + $0x28] sm:$0xff] }
   0xd   : > { %1420 = vmatpush3.msra.mxu0 %v384_v0  ;;  %s374_s20 = scalar_lea.vmem %s1908_s2, %s1383_s17  ;;  %s369_s26 = scalar_lea.vmem %s1907_s1, %s1382_s23  ;;  %v483_v8 = vld [vmem:[%s1906_s0] sm:$0xff]  ;;  %v871_v18 = vld [vmem:[%s1912_s6 + $0x18] sm:$0xff]  ;;  %v870_v19 = vld [vmem:[%s1912_s6 + $0x10] sm:$0xff]  ;;  %v1535_v49 = vmov 683565275  }
   0xe   : > { %v380_v1 = vld [vmem:[%s374_s20] sm:$0xff]  ;;  %v381_v2 = vld [vmem:[%s374_s20 + $0x8] sm:$0xff]  ;;  %v382_v3 = vld [vmem:[%s374_s20 + $0x10] sm:$0xff]  ;;  %1438 = vmatprep.subr.mxu0 %v569_v5  ;;  %1435 = vmatprep.mubr.msk.f32.mxu1 %vm485_vm1, %v483_v8  ;;  %v1536_v51 = vmov 2475754826   ;;  %s379_s19 = scalar_lea.vmem %s1916_s10, %s1382_s23 }
   0xf   : > { %1421 = vmatprep.mubr.msk.f32.mxu0 %vm385_vm0, %v380_v1  ;;  %v383_v4 = vld [vmem:[%s374_s20 + $0x18] sm:$0xff]  ;;  %v567_v6 = vld [vmem:[%s369_s26] sm:$0xff]  ;;  %v568_v7 = vld [vmem:[%s369_s26 + $0x8] sm:$0xff]  ;;  %v1537_v53 = vmov 2131351028  }
  0x10   : > { %1422 = vmatmul.mubr.msk.f32.vlgmr.msra.gmra.mxu0 %vm385_vm0, %v381_v2  ;;  %v872_v17 = vld [vmem:[%s1912_s6 + $0x20] sm:$0xff]  ;;  %v869_v20 = vld [vmem:[%s1912_s6 + $0x8] sm:$0xff]  ;;  %v1538_v55 = vmov 2102212464   ;;  %v1539_v57 = vmov 920167782  }
  0x11   : > { %1424 = vmatprep.mubr.msk.f32.mxu0 %vm385_vm0, %v382_v3  ;;  %1439 = vmatpush3.msra.mxu0 %v569_v5  ;;  %v868_v21 = vld [vmem:[%s1912_s6] sm:$0xff]  ;;  %v1540_v0 = vmov 1326507024  }
  0x12   : > { %v1357_v24 = vld [vmem:[%s1911_s5] ss:$0 sm:$0xff] }
  0x14   : > { %1425 = vmatmul.mubr.msk.f32.gmra.mxu0 %vm385_vm0, %v383_v4 }
  0x15   : > { %1440 = vmatprep.mubr.msk.f32.mxu0 %vm385_vm0, %v567_v6 }
  0x18   : > { %1441 = vmatmul.mubr.msk.f32.vlgmr.msra.gmra.mxu0 %vm385_vm0, %v568_v7 }
  0xd0   : > { %v1423_v9 = vpop.f32.mrf.mxu0 }
  0xd2   : > { %v464_v10 = vpop.f32.mrf.mxu0 }
  0xd4   : > { %v1426_v11 = vpop.f32.mrf.mxu0 }
  0xd5   : > { %1427 = vmatprep.subr.mxu1 %v1426_v11 }
  0xd6   : > { %v474_v12 = vpop.f32.mrf.mxu0  ;;  %1428 = vmatpush3.msra.mxu1 %v1426_v11 }
  0xd7   : > { %1429 = vmatprep.subr.mxu1 %v474_v12 }
  0xd8   : > { %1430 = vmatpush3.msra.mxu1 %v474_v12  ;;  %v1442_v22 = vpop.f32.mrf.mxu0 }
  0xd9   : > { %1431 = vmatprep.subr.mxu1 %v1423_v9 }
  0xda   : > { %1432 = vmatpush3.msra.mxu1 %v1423_v9  ;;  %v642_v26 = vpop.f32.mrf.mxu0 }
  0xdb   : > { %1433 = vmatprep.subr.mxu1 %v464_v10 }
  0xdc   : > { %1434 = vmatpush3.msra.mxu1 %v464_v10 }
  0xdd   : > { %1436 = vmatmul.mubr.msk.f32.vlgmr.msra.gmra.mxu1 %vm485_vm1, %v484_v13  ;;  %1443 = vmatprep.subr.mxu1 %v875_v14 }
  0xde   : > { %1444 = vmatpush3.msra.mxu1 %v875_v14 }
  0xdf   : > { %1445 = vmatprep.subr.mxu1 %v874_v15 }
  0xe0   : > { %1446 = vmatpush3.msra.mxu1 %v874_v15 }
  0xe1   : > { %1447 = vmatprep.subr.mxu1 %v873_v16 }
  0xe2   : > { %1448 = vmatpush3.msra.mxu1 %v873_v16 }
  0xe3   : > { %1449 = vmatprep.subr.mxu1 %v872_v17 }
  0xe4   : > { %1450 = vmatpush3.msra.mxu1 %v872_v17 }
  0xe5   : > { %1451 = vmatprep.subr.mxu1 %v871_v18 }
  0xe6   : > { %1452 = vmatpush3.msra.mxu1 %v871_v18 }
  0xe7   : > { %1453 = vmatprep.subr.mxu1 %v870_v19 }
  0xe8   : > { %1454 = vmatpush3.msra.mxu1 %v870_v19 }
  0xe9   : > { %1455 = vmatprep.subr.mxu1 %v869_v20 }
  0xea   : > { %1456 = vmatpush3.msra.mxu1 %v869_v20 }
  0xeb   : > { %1457 = vmatprep.subr.mxu1 %v868_v21 }
  0xec   : > { %1458 = vmatpush3.msra.mxu1 %v868_v21 }
 0x19d   : > { %v1437_v23 = vpop.f32.mrf.mxu1 }
 0x19e   : > { %v648_v25 = vadd.f32 %v1442_v22, %v1437_v23 }
 0x19f   : > { %v558_v27 = vpop.f32.mrf.mxu1 }
 0x1a0   : > { %v1661_v28 = vadd.f32 %v1357_v24, %v648_v25  ;;  %v643_v29 = vadd.f32 %v642_v26, %v558_v27 }
 0x1a2   : > { %v764_v30 = vand.u32 2147483647, %v1661_v28  ;;  %v767_v31 = vand.u32 2139095040, %v1661_v28  ;;  %v1665_v32 = vadd.f32 %v1357_v24, %v643_v29  ;;  %vm766_vm1 = vcmp.lt.s32.totalorder %v1661_v28, 0 }
 0x1a4   : > { %v768_v33 = vshrl.u32 %v767_v31, 23  ;;  %v771_v34 = vand.u32 8388607, %v764_v30  ;;  %v663_v35 = vand.u32 2139095040, %v1665_v32  ;;  %v660_v41 = vand.u32 2147483647, %v1665_v32 }
 0x1a6   : > { %v1362_v36 = vadd.s32 4294967169, %v768_v33  ;;  %v664_v37 = vshrl.u32 %v663_v35, 23  ;;  %v772_v39 = vor.u32 8388608, %v771_v34  ;;  %v1675_v47 = vand.u32 8388607, %v660_v41 }
 0x1a8   : > { %v774_v38 = vadd.s32 1, %v1362_v36  ;;  %v1358_v40 = vadd.s32 4294967169, %v664_v37  ;;  %v1671_v46 = vshll.u32 %v772_v39, 8  ;;  %v668_v35 = vor.u32 8388608, %v1675_v47 }
 0x1aa   : > { %vm775_vm2 = vcmp.gt.s32.totalorder %v774_v38, 0  ;;  %v670_v43 = vadd.s32 1, %v1358_v40 }
 0x1ab   : > { %v776_v42 = vsel %vm775_vm2, %v774_v38, 0  ;;  %vm1747_vm2 = vcmp.le.f32.partialorder %v764_v30, 0.7853982 }
 0x1ac   : > { %v777_v44 = vshrl.u32 %v776_v42, 5  ;;  %v778_v45 = vand.u32 31, %v776_v42  ;;  %vm671_vm3 = vcmp.gt.s32.totalorder %v670_v43, 0 }
 0x1ad   : > { %v672_v5 = vsel %vm671_vm3, %v670_v43, 0  ;;  %vm662_vm3 = vcmp.lt.s32.totalorder %v1665_v32, 0 }
 0x1ae   : > { %v779_v48 = vsub.s32 32, %v778_v45  ;;  %v781_v50 = vshll.u32 %v1535_v49, %v778_v45  ;;  %v784_v52 = vshll.u32 %v1536_v51, %v778_v45  ;;  %v787_v54 = vshll.u32 %v1537_v53, %v778_v45 }
 0x1af   : > { %v790_v56 = vshll.u32 %v1538_v55, %v778_v45  ;;  %v793_v58 = vshll.u32 %v1539_v57, %v778_v45  ;;  %vm796_vm4 = vcmp.lt.s32.totalorder %v777_v44, 1  ;;  %vm797_vm5 = vcmp.lt.s32.totalorder %v777_v44, 2 }
 0x1b0   : > { %v782_v59 = vshrl.u32 %v1536_v51, %v779_v48  ;;  %v785_v60 = vshrl.u32 %v1537_v53, %v779_v48  ;;  %v788_v61 = vshrl.u32 %v1538_v55, %v779_v48  ;;  %v780_v62 = vshrl.u32 %v1535_v49, %v779_v48 }
 0x1b1   : > { %v791_v63 = vshrl.u32 %v1539_v57, %v779_v48  ;;  %v794_v1 = vshrl.u32 %v1540_v0, %v779_v48  ;;  %vm798_vm6 = vcmp.lt.s32.totalorder %v777_v44, 3  ;;  %vm799_vm7 = vcmp.lt.s32.totalorder %v777_v44, 4 }
 0x1b2   : > { %v783_v2 = vor.u32 %v782_v59, %v781_v50  ;;  %v786_v3 = vor.u32 %v785_v60, %v784_v52  ;;  %v789_v4 = vor.u32 %v788_v61, %v787_v54  ;;  %v674_v8 = vand.u32 31, %v672_v5 }
 0x1b3   : > { %v792_v6 = vor.u32 %v791_v63, %v790_v56  ;;  %v795_v7 = vor.u32 %v794_v1, %v793_v58  ;;  %v673_v20 = vshrl.u32 %v672_v5, 5  ;;  %v708_v61 = vshll.u32 %v668_v35, 8 }
 0x1b4   : > { %v800_v9 = vsel %vm796_vm4, %v780_v62, %v783_v2  ;;  %v801_v10 = vsel %vm799_vm7, %v789_v4, 2102212464  ;;  %v804_v11 = vsel %vm796_vm4, %v783_v2, %v786_v3  ;;  %v808_v12 = vsel %vm796_vm4, %v786_v3, %v789_v4 }
 0x1b5   : > { %v802_v13 = vsel %vm798_vm6, %v786_v3, %v801_v10  ;;  %v805_v14 = vsel %vm799_vm7, %v792_v6, 920167782  ;;  %v809_v15 = vsel %vm799_vm7, %v795_v7, 1326507024  ;;  %v675_v16 = vsub.s32 32, %v674_v8 }
 0x1b6   : > { %v803_v17 = vsel %vm797_vm5, %v800_v9, %v802_v13  ;;  %v806_v18 = vsel %vm798_vm6, %v789_v4, %v805_v14  ;;  %v810_v19 = vsel %vm798_vm6, %v792_v6, %v809_v15  ;;  %v686_v23 = vshll.u32 %v1538_v55, %v674_v8 }
 0x1b7   : > { %v807_v21 = vsel %vm797_vm5, %v804_v11, %v806_v18  ;;  %v811_v22 = vsel %vm797_vm5, %v808_v12, %v810_v19  ;;  %v687_v24 = vshrl.u32 %v1539_v57, %v675_v16  ;;  %v689_v31 = vshll.u32 %v1539_v57, %v674_v8 }
 0x1b8   : > { %v1701_v25 = vmul.u32.u64.low %v1671_v46, %v811_v22  ;;  %v1702_v26 = vmul.u32.u64.high %v1671_v46, %v811_v22, %v1701_v25  ;;  %v1705_v27 = vmul.u32.u64.low %v1671_v46, %v807_v21  ;;  %v1706_v29 = vmul.u32.u64.high %v1671_v46, %v807_v21, %v1705_v27 }
 0x1b9   : > { %v690_v33 = vshrl.u32 %v1540_v0, %v675_v16  ;;  %v688_v34 = vor.u32 %v687_v24, %v686_v23  ;;  %v677_v36 = vshll.u32 %v1535_v49, %v674_v8  ;;  %v678_v37 = vshrl.u32 %v1536_v51, %v675_v16 }
 0x1ba   : > { %v819_v38 = vmul.u32 %v1671_v46, %v803_v17  ;;  %v680_v40 = vshll.u32 %v1536_v51, %v674_v8  ;;  %v681_v42 = vshrl.u32 %v1537_v53, %v675_v16  ;;  %vm821_vm8 = vc.u32 %v1702_v26, %v1705_v27 }
 0x1bb   : > { %v691_v39 = vor.u32 %v690_v33, %v689_v31  ;;  %v822_v43 = vadd.s32 1, %v1706_v29  ;;  %vm695_vm9 = vcmp.lt.s32.totalorder %v673_v20, 4  ;;  %v679_v44 = vor.u32 %v678_v37, %v677_v36 }
 0x1bc   : > { %v682_v47 = vor.u32 %v681_v42, %v680_v40  ;;  %v683_v48 = vshll.u32 %v1537_v53, %v674_v8  ;;  %v684_v50 = vshrl.u32 %v1538_v55, %v675_v16  ;;  %v701_v52 = vsel %vm695_vm9, %v688_v34, 920167782 }
 0x1bd   : > { %v705_v45 = vsel %vm695_vm9, %v691_v39, 1326507024  ;;  %v823_v46 = vsel %vm821_vm8, %v822_v43, %v1706_v29  ;;  %vm692_vm10 = vcmp.lt.s32.totalorder %v673_v20, 1  ;;  %vm694_vm11 = vcmp.lt.s32.totalorder %v673_v20, 3 }
 0x1be   : > { %v824_v54 = vadd.s32 %v823_v46, %v819_v38  ;;  %v685_v56 = vor.u32 %v684_v50, %v683_v48  ;;  %v700_v58 = vsel %vm692_vm10, %v679_v44, %v682_v47  ;;  %v706_v59 = vsel %vm694_vm11, %v688_v34, %v705_v45 }
 0x1bf   : > { %v676_v60 = vshrl.u32 %v1535_v49, %v675_v16  ;;  %vm693_vm12 = vcmp.lt.s32.totalorder %v673_v20, 2  ;;  %v820_v31 = vadd.s32 %v1705_v27, %v1702_v26  ;;  %vm661_vm4 = vcmp.le.f32.partialorder %v660_v41, 0.7853982 }
 0x1c0   : > { %v825_v62 = vadd.s32 536870912, %v824_v54  ;;  %v697_v63 = vsel %vm695_vm9, %v685_v56, 2102212464  ;;  %v702_v1 = vsel %vm694_vm11, %v685_v56, %v701_v52  ;;  %v704_v2 = vsel %vm692_vm10, %v682_v47, %v685_v56 }
 0x1c1   : > { %v696_v3 = vsel %vm692_vm10, %v676_v60, %v679_v44  ;;  %v703_v4 = vsel %vm693_vm12, %v700_v58, %v702_v1  ;;  %v707_v5 = vsel %vm693_vm12, %v704_v2, %v706_v59  ;;  %v698_v7 = vsel %vm694_vm11, %v682_v47, %v697_v63 }
 0x1c2   : > { %v1727_v6 = vshrl.u32 %v825_v62, 30  ;;  %v1730_v8 = vmul.u32.u64.low %v708_v61, %v707_v5  ;;  %v1731_v9 = vmul.u32.u64.high %v708_v61, %v707_v5, %v1730_v8  ;;  %v699_v13 = vsel %vm693_vm12, %v696_v3, %v698_v7 }
 0x1c3   : > { %v1733_v10 = vmul.u32.u64.low %v708_v61, %v703_v4  ;;  %v1734_v11 = vmul.u32.u64.high %v708_v61, %v703_v4, %v1733_v10  ;;  %v715_v17 = vmul.u32 %v708_v61, %v699_v13  ;;  %vm883_vm11 = vcmask 523264  }
 0x1c4   : > { %v827_v12 = vshll.u32 %v1727_v6, 30  ;;  %v850_v8 = vsub.s32 4, %v1727_v6  ;;  %vm752_vm12 = vweird.f32 %v1665_v32 }
 0x1c5   : > { %vm717_vm13 = vc.u32 %v1731_v9, %v1733_v10  ;;  %v718_v15 = vadd.s32 1, %v1734_v11  ;;  %v716_v26 = vadd.s32 %v1733_v10, %v1731_v9 }
 0x1c6   : > { %v828_v14 = vsub.s32 %v824_v54, %v827_v12  ;;  %v851_v12 = vsel %vm766_vm1, %v850_v8, %v1727_v6 }
 0x1c7   : > { %v719_v18 = vsel %vm717_vm13, %v718_v15, %v1734_v11  ;;  %vm856_vm13 = vweird.f32 %v1661_v28 }
 0x1c8   : > { %v830_v16 = vsub.s32 0, %v828_v14  ;;  %v720_v20 = vadd.s32 %v719_v18, %v715_v17 }
 0x1ca   : > { %v1363_v19 = vmin.u32 %v830_v16, %v828_v14  ;;  %v721_v22 = vadd.s32 536870912, %v720_v20 }
 0x1cc   : > { %v832_v21 = vclz %v1363_v19  ;;  %v722_v24 = vshrl.u32 %v721_v22, 30 }
 0x1ce   : > { %v1364_v23 = vadd.s32 4294967294, %v832_v21  ;;  %v723_v25 = vshll.u32 %v722_v24, 30  ;;  %v746_v10 = vsub.s32 4, %v722_v24 }
 0x1d0   : > { %vm1365_vm14 = vcmp.lt.s32.totalorder %v1364_v23, 0  ;;  %v724_v35 = vsub.s32 %v720_v20, %v723_v25  ;;  %v747_v13 = vsel %vm662_vm3, %v746_v10, %v722_v24 }
 0x1d1   : > { %v835_v29 = vsel %vm1365_vm14, 0, %v1364_v23  ;;  %v749_v15 = vsel %vm661_vm4, 0, %v747_v13 }
 0x1d2   : > { %v836_v33 = vsub.s32 32, %v835_v29  ;;  %v840_v34 = vsub.s32 4294967266, %v835_v29  ;;  %v837_v36 = vshll.u32 %v828_v14, %v835_v29  ;;  %v726_v39 = vsub.s32 0, %v724_v35 }
 0x1d3   : > { %v853_v14 = vsel %vm1747_vm2, 0, %v851_v12  ;;  %v753_v19 = vadd.s32 3, %v749_v15 }
 0x1d4   : > { %v838_v37 = vshrl.u32 %v820_v31, %v836_v33  ;;  %v841_v38 = vadd.s32 127, %v840_v34  ;;  %v1359_v43 = vmin.u32 %v726_v39, %v724_v35  ;;  %v857_v16 = vadd.s32 3, %v853_v14  ;;  %v1180_v39 = vld [vmem:[%s1914_s8 + $0x38] sm:$0xff] }
 0x1d5   : > { %v754_v22 = vand.u32 3, %v753_v19  ;;  %1462 = vmatprep.subr.mxu0 %v1180_v39 }
 0x1d6   : > { %v839_v40 = vor.u32 %v838_v37, %v837_v36  ;;  %v842_v42 = vshll.u32 %v841_v38, 23  ;;  %v728_v45 = vclz %v1359_v43  ;;  %v858_v20 = vand.u32 3, %v857_v16  ;;  %1463 = vmatpush3.msra.mxu0 %v1180_v39  ;;  %v1175_v43 = vld [vmem:[%s1914_s8 + $0x10] sm:$0xff] }
 0x1d7   : > { %vm759_vm7 = vcmp.eq.s32.totalorder %v754_v22, 2  ;;  %vm756_vm8 = vcmp.eq.s32.totalorder %v754_v22, 0  ;;  %vm755_vm10 = vcmp.lt.s32.totalorder %v754_v22, 2 }
 0x1d8   : > { %v843_v44 = vor.u32 4788187, %v842_v42  ;;  %v846_v48 = vcvt.s32.f32 %v839_v40  ;;  %v1360_v50 = vadd.s32 4294967294, %v728_v45  ;;  %vm860_vm5 = vcmp.eq.s32.totalorder %v858_v20, 0  ;;  %v1179_v40 = vld [vmem:[%s1914_s8 + $0x30] sm:$0xff]  ;;  %v1176_v42 = vld [vmem:[%s1914_s8 + $0x18] sm:$0xff] }
 0x1d9   : > { %vm863_vm6 = vcmp.eq.s32.totalorder %v858_v20, 2  ;;  %vm859_vm9 = vcmp.lt.s32.totalorder %v858_v20, 2  ;;  %1464 = vmatprep.subr.mxu0 %v1179_v40  ;;  %v1173_v45 = vld [vmem:[%s1914_s8] sm:$0xff] }
 0x1da   : > { %v844_v47 = vand.u32 2147483647, %v843_v44  ;;  %vm1361_vm15 = vcmp.lt.s32.totalorder %v1360_v50, 0  ;;  %1465 = vmatpush3.msra.mxu0 %v1179_v40  ;;  %v1174_v44 = vld [vmem:[%s1914_s8 + $0x8] sm:$0xff] }
 0x1db   : > { %v731_v52 = vsel %vm1361_vm15, 0, %v1360_v50 }
 0x1dc   : > { %v847_v46 = vmul.f32 %v846_v48, %v844_v47  ;;  %v732_v27 = vsub.s32 32, %v731_v52  ;;  %v736_v56 = vsub.s32 4294967266, %v731_v52  ;;  %v733_v58 = vshll.u32 %v724_v35, %v731_v52  ;;  %v1366_v47 = vld [vmem:[%s1913_s7] ss:$0 sm:$0xff] }
 0x1de   : > { %v848_v54 = vxor.u32 2147483648, %v847_v46  ;;  %v734_v59 = vshrl.u32 %v716_v26, %v732_v27  ;;  %v737_v60 = vadd.s32 127, %v736_v56 }
 0x1e0   : > { %v849_v61 = vsel %vm766_vm1, %v848_v54, %v847_v46  ;;  %v735_v62 = vor.u32 %v734_v59, %v733_v58  ;;  %v738_v63 = vshll.u32 %v737_v60, 23 }
 0x1e1   : > { %v852_v2 = vsel %vm1747_vm2, %v1661_v28, %v849_v61  ;;  %v1177_v28 = vld [vmem:[%s1914_s8 + $0x20] sm:$0xff] }
 0x1e2   : > { %v739_v3 = vor.u32 4788187, %v738_v63  ;;  %v742_v5 = vcvt.s32.f32 %v735_v62  ;;  %1511 = vcosq.f32 %v852_v2 }
 0x1e3   : > { %1513 = vsinq.f32 %v852_v2 }
 0x1e4   : > { %v740_v4 = vand.u32 2147483647, %v739_v3 }
 0x1e6   : > { %v743_v7 = vmul.f32 %v742_v5, %v740_v4 }
 0x1e8   : > { %v744_v9 = vxor.u32 2147483648, %v743_v7 }
 0x1ea   : > { %v745_v30 = vsel %vm662_vm3, %v744_v9, %v743_v7 }
 0x1eb   : > { %v748_v11 = vsel %vm661_vm4, %v1665_v32, %v745_v30  ;;  %v1178_v32 = vld [vmem:[%s1914_s8 + $0x28] sm:$0xff] }
 0x1ec   : > { %1515 = vcosq.f32 %v748_v11  ;;  %1466 = vmatprep.subr.mxu0 %v1178_v32 }
 0x1ed   : > { %1517 = vsinq.f32 %v748_v11  ;;  %1467 = vmatpush3.msra.mxu0 %v1178_v32 }
 0x1ee   : > { %1468 = vmatprep.subr.mxu0 %v1177_v28 }
 0x1ef   : > { %v1512_v17 = vpop.eup %1511  ;;  %1469 = vmatpush3.msra.mxu0 %v1177_v28 }
 0x1f0   : > { %v1514_v18 = vpop.eup %1513  ;;  %v864_v21 = vxor.u32 2147483648, %v1512_v17  ;;  %1470 = vmatprep.subr.mxu0 %v1176_v42 }
 0x1f1   : > { %v861_v41 = vxor.u32 2147483648, %v1514_v18  ;;  %1471 = vmatpush3.msra.mxu0 %v1176_v42 }
 0x1f2   : > { %v865_v24 = vsel %vm863_vm6, %v864_v21, %v1514_v18  ;;  %1472 = vmatprep.subr.mxu0 %v1175_v43 }
 0x1f3   : > { %v862_v29 = vsel %vm860_vm5, %v1512_v17, %v861_v41  ;;  %1473 = vmatpush3.msra.mxu0 %v1175_v43 }
 0x1f4   : > { %v866_v35 = vsel %vm859_vm9, %v862_v29, %v865_v24  ;;  %1474 = vmatprep.subr.mxu0 %v1174_v44 }
 0x1f5   : > { %v867_v38 = vsel %vm856_vm13, nan, %v866_v35  ;;  %1475 = vmatpush3.msra.mxu0 %v1174_v44 }
 0x1f6   : > { %1476 = vmatprep.subr.mxu0 %v1173_v45 }
 0x1f7   : > { %1477 = vmatpush3.msra.mxu0 %v1173_v45 }
 0x1f9   : > { %v1516_v23 = vpop.eup %1515 }
 0x1fa   : > { %v1518_v25 = vpop.eup %1517  ;;  %v760_v6 = vxor.u32 2147483648, %v1516_v23 }
 0x1fb   : > { %v757_v31 = vxor.u32 2147483648, %v1518_v25 }
 0x1fc   : > { %v761_v33 = vsel %vm759_vm7, %v760_v6, %v1518_v25 }
 0x1fd   : > { %v758_v34 = vsel %vm756_vm8, %v1516_v23, %v757_v31 }
 0x1fe   : > { %v762_v36 = vsel %vm755_vm10, %v758_v34, %v761_v33 }
 0x1ff   : > { %v763_v37 = vsel %vm752_vm12, nan, %v762_v36 }
 0x200   : > { %1459 = vmatprep.mubr.msk.f32.mxu1 %vm883_vm11, %v763_v37 }
 0x201   : > { %1460 = vmatmul.mubr.msk.f32.vlgmr.msra.gmra.mxu1 %vm883_vm11, %v867_v38 }
 0x2c1   : > { %v1461_v48 = vpop.f32.mrf.mxu1 }
 0x2c2   : > { %v1795_v50 = vadd.f32 %v1461_v48, %v1366_v47 }
 0x2c3   : > { %v956_v46 = vpop.f32.mrf.mxu1 }
 0x2c4   : > { %v1069_v52 = vand.u32 2147483647, %v1795_v50  ;;  %v1072_v54 = vand.u32 2139095040, %v1795_v50  ;;  %v1799_v26 = vadd.f32 %v1366_v47, %v956_v46 }
 0x2c6   : > { %v1073_v27 = vshrl.u32 %v1072_v54, 23  ;;  %v1076_v56 = vand.u32 8388607, %v1069_v52  ;;  %v968_v58 = vand.u32 2139095040, %v1799_v26  ;;  %v965_v60 = vand.u32 2147483647, %v1799_v26 }
 0x2c8   : > { %v1373_v59 = vadd.s32 4294967169, %v1073_v27  ;;  %v969_v61 = vshrl.u32 %v968_v58, 23  ;;  %v1077_v63 = vor.u32 8388608, %v1076_v56  ;;  %v972_v2 = vand.u32 8388607, %v965_v60 }
 0x2ca   : > { %v1079_v62 = vadd.s32 1, %v1373_v59  ;;  %v1369_v1 = vadd.s32 4294967169, %v969_v61  ;;  %v1807_v8 = vshll.u32 %v1077_v63, 8  ;;  %v973_v30 = vor.u32 8388608, %v972_v2 }
 0x2cc   : > { %vm1080_vm14 = vcmp.gt.s32.totalorder %v1079_v62, 0  ;;  %v975_v4 = vadd.s32 1, %v1369_v1  ;;  %v1013_v32 = vshll.u32 %v973_v30, 8 }
 0x2cd   : > { %v1081_v3 = vsel %vm1080_vm14, %v1079_v62, 0  ;;  %vm1071_vm14 = vcmp.lt.s32.totalorder %v1795_v50, 0 }
 0x2ce   : > { %v1082_v5 = vshrl.u32 %v1081_v3, 5  ;;  %v1083_v7 = vand.u32 31, %v1081_v3  ;;  %vm976_vm15 = vcmp.gt.s32.totalorder %v975_v4, 0 }
 0x2cf   : > { %v977_v23 = vsel %vm976_vm15, %v975_v4, 0  ;;  %vm1872_vm15 = vcmp.le.f32.partialorder %v1069_v52, 0.7853982 }
 0x2d0   : > { %v1084_v9 = vsub.s32 32, %v1083_v7  ;;  %v1086_v10 = vshll.u32 %v1535_v49, %v1083_v7  ;;  %v1089_v11 = vshll.u32 %v1536_v51, %v1083_v7  ;;  %v1092_v12 = vshll.u32 %v1537_v53, %v1083_v7 }
 0x2d1   : > { %v1095_v13 = vshll.u32 %v1538_v55, %v1083_v7  ;;  %v1098_v14 = vshll.u32 %v1539_v57, %v1083_v7  ;;  %vm1101_vm1 = vcmp.lt.s32.totalorder %v1082_v5, 1  ;;  %vm1103_vm2 = vcmp.lt.s32.totalorder %v1082_v5, 3 }
 0x2d2   : > { %v1087_v15 = vshrl.u32 %v1536_v51, %v1084_v9  ;;  %v1090_v16 = vshrl.u32 %v1537_v53, %v1084_v9  ;;  %v1093_v17 = vshrl.u32 %v1538_v55, %v1084_v9  ;;  %v1085_v18 = vshrl.u32 %v1535_v49, %v1084_v9 }
 0x2d3   : > { %v1096_v19 = vshrl.u32 %v1539_v57, %v1084_v9  ;;  %v1099_v20 = vshrl.u32 %v1540_v0, %v1084_v9  ;;  %vm1104_vm3 = vcmp.lt.s32.totalorder %v1082_v5, 4  ;;  %v979_v29 = vand.u32 31, %v977_v23 }
 0x2d4   : > { %v1088_v41 = vor.u32 %v1087_v15, %v1086_v10  ;;  %v1091_v21 = vor.u32 %v1090_v16, %v1089_v11  ;;  %v1094_v22 = vor.u32 %v1093_v17, %v1092_v12  ;;  %vm1102_vm4 = vcmp.lt.s32.totalorder %v1082_v5, 2 }
 0x2d5   : > { %v1097_v25 = vor.u32 %v1096_v19, %v1095_v13  ;;  %v1100_v6 = vor.u32 %v1099_v20, %v1098_v14  ;;  %v980_v38 = vsub.s32 32, %v979_v29  ;;  %v978_v44 = vshrl.u32 %v977_v23, 5 }
 0x2d6   : > { %v1105_v24 = vsel %vm1101_vm1, %v1085_v18, %v1088_v41  ;;  %v1106_v31 = vsel %vm1104_vm3, %v1094_v22, 2102212464  ;;  %v1109_v33 = vsel %vm1101_vm1, %v1088_v41, %v1091_v21  ;;  %v1113_v34 = vsel %vm1101_vm1, %v1091_v21, %v1094_v22 }
 0x2d7   : > { %v1107_v35 = vsel %vm1103_vm2, %v1091_v21, %v1106_v31  ;;  %v1110_v36 = vsel %vm1104_vm3, %v1097_v25, 920167782  ;;  %v1114_v37 = vsel %vm1104_vm3, %v1100_v6, 1326507024  ;;  %v982_v54 = vshll.u32 %v1535_v49, %v979_v29 }
 0x2d8   : > { %v1111_v39 = vsel %vm1103_vm2, %v1094_v22, %v1110_v36  ;;  %v1115_v40 = vsel %vm1103_vm2, %v1097_v25, %v1114_v37  ;;  %v1108_v28 = vsel %vm1102_vm4, %v1105_v24, %v1107_v35  ;;  %v983_v27 = vshrl.u32 %v1536_v51, %v980_v38 }
 0x2d9   : > { %v1112_v42 = vsel %vm1102_vm4, %v1109_v33, %v1111_v39  ;;  %v1116_v43 = vsel %vm1102_vm4, %v1113_v34, %v1115_v40  ;;  %v985_v56 = vshll.u32 %v1536_v51, %v979_v29  ;;  %v986_v58 = vshrl.u32 %v1537_v53, %v980_v38 }
 0x2da   : > { %v1828_v45 = vmul.u32.u64.low %v1807_v8, %v1116_v43  ;;  %v1829_v47 = vmul.u32.u64.high %v1807_v8, %v1116_v43, %v1828_v45  ;;  %v1832_v48 = vmul.u32.u64.low %v1807_v8, %v1112_v42  ;;  %v1833_v46 = vmul.u32.u64.high %v1807_v8, %v1112_v42, %v1832_v48 }
 0x2db   : > { %v988_v59 = vshll.u32 %v1537_v53, %v979_v29  ;;  %v989_v61 = vshrl.u32 %v1538_v55, %v980_v38  ;;  %v991_v62 = vshll.u32 %v1538_v55, %v979_v29  ;;  %v992_v63 = vshrl.u32 %v1539_v57, %v980_v38 }
 0x2dc   : > { %v984_v1 = vor.u32 %v983_v27, %v982_v54  ;;  %v987_v2 = vor.u32 %v986_v58, %v985_v56  ;;  %v994_v3 = vshll.u32 %v1539_v57, %v979_v29  ;;  %v995_v4 = vshrl.u32 %v1540_v0, %v980_v38 }
 0x2dd   : > { %v1124_v5 = vmul.u32 %v1807_v8, %v1108_v28  ;;  %vm1126_vm5 = vc.u32 %v1829_v47, %v1832_v48  ;;  %v1127_v51 = vadd.s32 1, %v1833_v46  ;;  %v990_v53 = vor.u32 %v989_v61, %v988_v59 }
 0x2de   : > { %v981_v7 = vshrl.u32 %v1535_v49, %v980_v38  ;;  %v993_v9 = vor.u32 %v992_v63, %v991_v62  ;;  %v996_v55 = vor.u32 %v995_v4, %v994_v3  ;;  %vm997_vm6 = vcmp.lt.s32.totalorder %v978_v44, 1 }
 0x2df   : > { %v1128_v10 = vsel %vm1126_vm5, %v1127_v51, %v1833_v46  ;;  %vm999_vm7 = vcmp.lt.s32.totalorder %v978_v44, 3  ;;  %vm1000_vm8 = vcmp.lt.s32.totalorder %v978_v44, 4  ;;  %v1005_v57 = vsel %vm997_vm6, %v984_v1, %v987_v2 }
 0x2e0   : > { %v1129_v30 = vadd.s32 %v1128_v10, %v1124_v5  ;;  %v1002_v0 = vsel %vm1000_vm8, %v990_v53, 2102212464  ;;  %v1006_v11 = vsel %vm1000_vm8, %v993_v9, 920167782  ;;  %v1009_v8 = vsel %vm997_vm6, %v987_v2, %v990_v53 }
 0x2e1   : > { %vm998_vm9 = vcmp.lt.s32.totalorder %v978_v44, 2  ;;  %v1001_v12 = vsel %vm997_vm6, %v981_v7, %v984_v1  ;;  %v1007_v13 = vsel %vm999_vm7, %v990_v53, %v1006_v11  ;;  %v1010_v14 = vsel %vm1000_vm8, %v996_v55, 1326507024 }
 0x2e2   : > { %v1130_v15 = vadd.s32 536870912, %v1129_v30  ;;  %v1003_v16 = vsel %vm999_vm7, %v987_v2, %v1002_v0  ;;  %v1008_v17 = vsel %vm998_vm9, %v1005_v57, %v1007_v13  ;;  %v1011_v49 = vsel %vm999_vm7, %v993_v9, %v1010_v14 }
 0x2e3   : > { %v1012_v18 = vsel %vm998_vm9, %v1009_v8, %v1011_v49  ;;  %v1852_v19 = vmul.u32.u64.low %v1013_v32, %v1008_v17  ;;  %v1853_v20 = vmul.u32.u64.high %v1013_v32, %v1008_v17, %v1852_v19  ;;  %v1004_v23 = vsel %vm998_vm9, %v1001_v12, %v1003_v16 }
 0x2e4   : > { %v1855_v41 = vshrl.u32 %v1130_v15, 30  ;;  %v1857_v21 = vmul.u32.u64.low %v1013_v32, %v1012_v18  ;;  %v1858_v22 = vmul.u32.u64.high %v1013_v32, %v1012_v18, %v1857_v21  ;;  %v1020_v24 = vmul.u32 %v1013_v32, %v1004_v23 }
 0x2e5   : > { %v1023_v6 = vadd.s32 1, %v1853_v20  ;;  %v1125_v43 = vadd.s32 %v1832_v48, %v1829_v47  ;;  %vm967_vm1 = vcmp.lt.s32.totalorder %v1799_v26, 0  ;;  %vm966_vm2 = vcmp.le.f32.partialorder %v965_v60, 0.7853982 }
 0x2e6   : > { %v1132_v25 = vshll.u32 %v1855_v41, 30  ;;  %vm1022_vm10 = vc.u32 %v1858_v22, %v1852_v19  ;;  %v1021_v5 = vadd.s32 %v1852_v19, %v1858_v22  ;;  %v1155_v14 = vsub.s32 4, %v1855_v41 }
 0x2e7   : > { %v1024_v31 = vsel %vm1022_vm10, %v1023_v6, %v1853_v20  ;;  %vm1057_vm9 = vweird.f32 %v1799_v26  ;;  %vm1161_vm10 = vweird.f32 %v1795_v50 }
 0x2e8   : > { %v1133_v29 = vsub.s32 %v1129_v30, %v1132_v25  ;;  %v1025_v34 = vadd.s32 %v1024_v31, %v1020_v24  ;;  %v1156_v49 = vsel %vm1071_vm14, %v1155_v14, %v1855_v41 }
 0x2e9   : > { %v1158_v19 = vsel %vm1872_vm15, 0, %v1156_v49 }
 0x2ea   : > { %v1135_v33 = vsub.s32 0, %v1133_v29  ;;  %v1026_v36 = vadd.s32 536870912, %v1025_v34  ;;  %v1162_v21 = vadd.s32 3, %v1158_v19 }
 0x2ec   : > { %v1374_v35 = vmin.u32 %v1135_v33, %v1133_v29  ;;  %v1027_v38 = vshrl.u32 %v1026_v36, 30  ;;  %v1163_v6 = vand.u32 3, %v1162_v21 }
 0x2ee   : > { %v1137_v37 = vclz %v1374_v35  ;;  %v1028_v40 = vshll.u32 %v1027_v38, 30  ;;  %v1051_v16 = vsub.s32 4, %v1027_v38  ;;  %vm1165_vm3 = vcmp.eq.s32.totalorder %v1163_v6, 0 }
 0x2ef   : > { %vm1168_vm4 = vcmp.eq.s32.totalorder %v1163_v6, 2  ;;  %vm1164_vm7 = vcmp.lt.s32.totalorder %v1163_v6, 2 }
 0x2f0   : > { %v1375_v39 = vadd.s32 4294967294, %v1137_v37  ;;  %v1029_v28 = vsub.s32 %v1025_v34, %v1028_v40  ;;  %v1052_v18 = vsel %vm967_vm1, %v1051_v16, %v1027_v38 }
 0x2f1   : > { %v1054_v20 = vsel %vm966_vm2, 0, %v1052_v18 }
 0x2f2   : > { %vm1376_vm12 = vcmp.lt.s32.totalorder %v1375_v39, 0  ;;  %v1031_v45 = vsub.s32 0, %v1029_v28  ;;  %v1058_v25 = vadd.s32 3, %v1054_v20 }
 0x2f3   : > { %v1140_v42 = vsel %vm1376_vm12, 0, %v1375_v39 }
 0x2f4   : > { %v1141_v44 = vsub.s32 32, %v1140_v42  ;;  %v1145_v32 = vsub.s32 4294967266, %v1140_v42  ;;  %v1142_v46 = vshll.u32 %v1133_v29, %v1140_v42  ;;  %v1370_v56 = vmin.u32 %v1031_v45, %v1029_v28 }
 0x2f5   : > { %v1059_v24 = vand.u32 3, %v1058_v25 }
 0x2f6   : > { %v1143_v54 = vshrl.u32 %v1125_v43, %v1141_v44  ;;  %v1146_v27 = vadd.s32 127, %v1145_v32  ;;  %v1033_v61 = vclz %v1370_v56  ;;  %v1377_v43 = vld [vmem:[%s1915_s9] ss:$0 sm:$0xff] }
 0x2f7   : > { %vm1064_vm5 = vcmp.eq.s32.totalorder %v1059_v24, 2  ;;  %vm1061_vm6 = vcmp.eq.s32.totalorder %v1059_v24, 0  ;;  %vm1060_vm8 = vcmp.lt.s32.totalorder %v1059_v24, 2 }
 0x2f8   : > { %v1144_v58 = vor.u32 %v1143_v54, %v1142_v46  ;;  %v1147_v59 = vshll.u32 %v1146_v27, 23  ;;  %v1371_v63 = vadd.s32 4294967294, %v1033_v61 }
 0x2fa   : > { %v1148_v62 = vor.u32 4788187, %v1147_v59  ;;  %v1151_v2 = vcvt.s32.f32 %v1144_v58  ;;  %vm1372_vm13 = vcmp.lt.s32.totalorder %v1371_v63, 0 }
 0x2fb   : > { %v1036_v3 = vsel %vm1372_vm13, 0, %v1371_v63 }
 0x2fc   : > { %v1149_v1 = vand.u32 2147483647, %v1148_v62  ;;  %v1037_v47 = vsub.s32 32, %v1036_v3  ;;  %v1041_v48 = vsub.s32 4294967266, %v1036_v3  ;;  %v1038_v53 = vshll.u32 %v1029_v28, %v1036_v3 }
 0x2fe   : > { %v1152_v4 = vmul.f32 %v1151_v2, %v1149_v1  ;;  %v1039_v7 = vshrl.u32 %v1021_v5, %v1037_v47  ;;  %v1042_v9 = vadd.s32 127, %v1041_v48 }
 0x300   : > { %v1153_v51 = vxor.u32 2147483648, %v1152_v4  ;;  %v1040_v10 = vor.u32 %v1039_v7, %v1038_v53  ;;  %v1043_v57 = vshll.u32 %v1042_v9, 23 }
 0x302   : > { %v1154_v55 = vsel %vm1071_vm14, %v1153_v51, %v1152_v4  ;;  %v1044_v11 = vor.u32 4788187, %v1043_v57  ;;  %v1047_v12 = vcvt.s32.f32 %v1040_v10 }
 0x303   : > { %v1157_v0 = vsel %vm1872_vm15, %v1795_v50, %v1154_v55 }
 0x304   : > { %v1045_v8 = vand.u32 2147483647, %v1044_v11  ;;  %1519 = vcosq.f32 %v1157_v0 }
 0x305   : > { %1521 = vsinq.f32 %v1157_v0 }
 0x306   : > { %v1048_v13 = vmul.f32 %v1047_v12, %v1045_v8 }
 0x308   : > { %v1049_v15 = vxor.u32 2147483648, %v1048_v13 }
 0x30a   : > { %v1050_v52 = vsel %vm967_vm1, %v1049_v15, %v1048_v13 }
 0x30b   : > { %v1053_v17 = vsel %vm966_vm2, %v1799_v26, %v1050_v52 }
 0x30c   : > { %1523 = vcosq.f32 %v1053_v17 }
 0x30d   : > { %1525 = vsinq.f32 %v1053_v17 }
 0x311   : > { %v1520_v22 = vpop.eup %1519 }
 0x312   : > { %v1522_v23 = vpop.eup %1521  ;;  %v1169_v29 = vxor.u32 2147483648, %v1520_v22 }
 0x313   : > { %v1166_v60 = vxor.u32 2147483648, %v1522_v23 }
 0x314   : > { %v1170_v35 = vsel %vm1168_vm4, %v1169_v29, %v1522_v23 }
 0x315   : > { %v1167_v34 = vsel %vm1165_vm3, %v1520_v22, %v1166_v60 }
 0x316   : > { %v1171_v39 = vsel %vm1164_vm7, %v1167_v34, %v1170_v35 }
 0x317   : > { %v1172_v42 = vsel %vm1161_vm10, nan, %v1171_v39 }
 0x319   : > { %v1524_v31 = vpop.eup %1523 }
 0x31a   : > { %v1526_v33 = vpop.eup %1525  ;;  %v1065_v41 = vxor.u32 2147483648, %v1524_v31 }
 0x31b   : > { %v1062_v36 = vxor.u32 2147483648, %v1526_v33 }
 0x31c   : > { %v1066_v37 = vsel %vm1064_vm5, %v1065_v41, %v1526_v33 }
 0x31d   : > { %v1063_v38 = vsel %vm1061_vm6, %v1524_v31, %v1062_v36 }
 0x31e   : > { %v1067_v40 = vsel %vm1060_vm8, %v1063_v38, %v1066_v37 }
 0x31f   : > { %v1068_v28 = vsel %vm1057_vm9, nan, %v1067_v40 }
 0x320   : > { %1478 = vmatprep.mubr.msk.f32.mxu0 %vm883_vm11, %v1068_v28 }
 0x321   : > { %1479 = vmatmul.mubr.msk.f32.vlgmr.msra.gmra.mxu0 %vm883_vm11, %v1172_v42 }
 0x3e1   : > { %v1480_v44 = vpop.f32.mrf.mxu0 }
 0x3e2   : > { %v1266_v26 = vadd.f32 %v1480_v44, %v1377_v43 }
 0x3e3   : > { %v1260_v32 = vpop.f32.mrf.mxu0 }
 0x3e4   : > { %1270 = vst.msk [vmem:[%s379_s19 + $0x8] sm:$0xff] %vm385_vm0, %v1266_v26  ;;  %v1261_v50 = vadd.f32 %v1377_v43, %v1260_v32 }
 0x3e6   : > { %1269 = vst.msk [vmem:[%s379_s19] sm:$0xff] %vm385_vm0, %v1261_v50 }
 0x3e7 PF: > { %s20_s13 = sadd.s32 1, %s1533_s13  }
 0x3e8   : > { %p17_p4 = scmp.ge.s32.totalorder %s20_s13, 4  }
 0x3ea   :  { %19 = sbr.rel (!%p17_p4) target bundleno = 1 (0x1), region = 93 }

// kernel: tpu_custom_call.1
= control target key start
LH: loop header
LB: loop body
LE: loop exit
PB: predicated region body
PF: predicated region fallthrough
CT: control target
= control target key end

     0   :  { %s1596_s13 = smov 0   ;;  %s1906_s0 = inlined_call_operand.vmem [shape: f32[16,32], index: 0, kind: input, shape index: {}]   ;;  %s1907_s1 = inlined_call_operand.vmem [shape: f32[2,16,8], index: 1, kind: input, shape index: {}]   ;;  %s1908_s2 = inlined_call_operand.vmem [shape: f32[2,32,8], index: 2, kind: input, shape index: {}]   ;;  %s1909_s3 = inlined_call_operand.vmem [shape: f32[8,64], index: 3, kind: input, shape index: {}]   ;;  %s1910_s4 = inlined_call_operand.vmem [shape: f32[8,64], index: 4, kind: input, shape index: {}]   ;;  %s1911_s5 = inlined_call_operand.vmem [shape: f32[1,64], index: 5, kind: input, shape index: {}]   ;;  %s1912_s6 = inlined_call_operand.vmem [shape: f32[64,64], index: 6, kind: input, shape index: {}]   ;;  %s1913_s7 = inlined_call_operand.vmem [shape: f32[1,64], index: 7, kind: input, shape index: {}]   ;;  %s1914_s8 = inlined_call_operand.vmem [shape: f32[64,8], index: 8, kind: input, shape index: {}]   ;;  %s1915_s9 = inlined_call_operand.vmem [shape: f32[1,8], index: 9, kind: input, shape index: {}]   ;;  %s1916_s10 = inlined_call_operand.vmem [shape: f32[2,16,8], index: 10, kind: output, shape index: {}]  }
   0x1 LB: > { %s1338_s14 = sadd.s32 4294967295, %s1533_s13   ;;  %p1342_p0 = scmp.ge.s32.totalorder %s1533_s13, 1  ;;  %s1533_s13 = sphi %s1596_s13, %s20_s13  }
   0x2   : > { %p322_p1 = scmp.lt.s32.totalorder %s1533_s13, 3 }
   0x4   : > { %p323_p2 = pnand %p1342_p0, %p322_p1 }
   0x5   : > { %p365_p3 = scmp.lt.s32.totalorder (!%p323_p2), %s1338_s14, 1 }
   0x6   : > { %326 = sbr.rel (%p323_p2) target bundleno = 999 (0x3e7), region = 60 }
   0xb   : > { %v384_v0 = vld [vmem:[%s1910_s4] sm:$0xff]  ;;  %s1922_s14 = smov (!%p365_p3, %s1338_s14), 1  ;;  %vm385_vm0 = vcmask 64512   ;;  %vm485_vm1 = vcmask 261120   ;;  %v484_v13 = vld [vmem:[%s1906_s0 + $0x8] sm:$0xff]  ;;  %v875_v14 = vld [vmem:[%s1912_s6 + $0x38] sm:$0xff] }
   0xc   : > { %1419 = vmatprep.subr.mxu0 %v384_v0  ;;  %s1383_s17 = sshll.u32 %s1922_s14, 5  ;;  %v569_v5 = vld [vmem:[%s1909_s3] sm:$0xff]  ;;  %s1382_s23 = sshll.u32 %s1922_s14, 4  ;;  %v874_v15 = vld [vmem:[%s1912_s6 + $0x30] sm:$0xff]  ;;  %v873_v16 = vld [vmem:[%s1912_s6 + $0x28] sm:$0xff] }
   0xd   : > { %1420 = vmatpush3.msra.mxu0 %v384_v0  ;;  %s374_s20 = scalar_lea.vmem %s1908_s2, %s1383_s17  ;;  %s369_s26 = scalar_lea.vmem %s1907_s1, %s1382_s23  ;;  %v483_v8 = vld [vmem:[%s1906_s0] sm:$0xff]  ;;  %v871_v18 = vld [vmem:[%s1912_s6 + $0x18] sm:$0xff]  ;;  %v870_v19 = vld [vmem:[%s1912_s6 + $0x10] sm:$0xff]  ;;  %v1535_v49 = vmov 683565275  }
   0xe   : > { %v380_v1 = vld [vmem:[%s374_s20] sm:$0xff]  ;;  %v381_v2 = vld [vmem:[%s374_s20 + $0x8] sm:$0xff]  ;;  %v382_v3 = vld [vmem:[%s374_s20 + $0x10] sm:$0xff]  ;;  %1438 = vmatprep.subr.mxu0 %v569_v5  ;;  %1435 = vmatprep.mubr.msk.f32.mxu1 %vm485_vm1, %v483_v8  ;;  %v1536_v51 = vmov 2475754826   ;;  %s379_s19 = scalar_lea.vmem %s1916_s10, %s1382_s23 }
   0xf   : > { %1421 = vmatprep.mubr.msk.f32.mxu0 %vm385_vm0, %v380_v1  ;;  %v383_v4 = vld [vmem:[%s374_s20 + $0x18] sm:$0xff]  ;;  %v567_v6 = vld [vmem:[%s369_s26] sm:$0xff]  ;;  %v568_v7 = vld [vmem:[%s369_s26 + $0x8] sm:$0xff]  ;;  %v1537_v53 = vmov 2131351028  }
  0x10   : > { %1422 = vmatmul.mubr.msk.f32.vlgmr.msra.gmra.mxu0 %vm385_vm0, %v381_v2  ;;  %v872_v17 = vld [vmem:[%s1912_s6 + $0x20] sm:$0xff]  ;;  %v869_v20 = vld [vmem:[%s1912_s6 + $0x8] sm:$0xff]  ;;  %v1538_v55 = vmov 2102212464   ;;  %v1539_v57 = vmov 920167782  }
  0x11   : > { %1424 = vmatprep.mubr.msk.f32.mxu0 %vm385_vm0, %v382_v3  ;;  %1439 = vmatpush3.msra.mxu0 %v569_v5  ;;  %v868_v21 = vld [vmem:[%s1912_s6] sm:$0xff]  ;;  %v1540_v0 = vmov 1326507024  }
  0x12   : > { %v1357_v24 = vld [vmem:[%s1911_s5] ss:$0 sm:$0xff] }
  0x14   : > { %1425 = vmatmul.mubr.msk.f32.gmra.mxu0 %vm385_vm0, %v383_v4 }
  0x15   : > { %1440 = vmatprep.mubr.msk.f32.mxu0 %vm385_vm0, %v567_v6 }
  0x18   : > { %1441 = vmatmul.mubr.msk.f32.vlgmr.msra.gmra.mxu0 %vm385_vm0, %v568_v7 }
  0xd0   : > { %v1423_v9 = vpop.f32.mrf.mxu0 }
  0xd2   : > { %v464_v10 = vpop.f32.mrf.mxu0 }
  0xd4   : > { %v1426_v11 = vpop.f32.mrf.mxu0 }
  0xd5   : > { %1427 = vmatprep.subr.mxu1 %v1426_v11 }
  0xd6   : > { %v474_v12 = vpop.f32.mrf.mxu0  ;;  %1428 = vmatpush3.msra.mxu1 %v1426_v11 }
  0xd7   : > { %1429 = vmatprep.subr.mxu1 %v474_v12 }
  0xd8   : > { %1430 = vmatpush3.msra.mxu1 %v474_v12  ;;  %v1442_v22 = vpop.f32.mrf.mxu0 }
  0xd9   : > { %1431 = vmatprep.subr.mxu1 %v1423_v9 }
  0xda   : > { %1432 = vmatpush3.msra.mxu1 %v1423_v9  ;;  %v642_v26 = vpop.f32.mrf.mxu0 }
  0xdb   : > { %1433 = vmatprep.subr.mxu1 %v464_v10 }
  0xdc   : > { %1434 = vmatpush3.msra.mxu1 %v464_v10 }
  0xdd   : > { %1436 = vmatmul.mubr.msk.f32.vlgmr.msra.gmra.mxu1 %vm485_vm1, %v484_v13  ;;  %1443 = vmatprep.subr.mxu1 %v875_v14 }
  0xde   : > { %1444 = vmatpush3.msra.mxu1 %v875_v14 }
  0xdf   : > { %1445 = vmatprep.subr.mxu1 %v874_v15 }
  0xe0   : > { %1446 = vmatpush3.msra.mxu1 %v874_v15 }
  0xe1   : > { %1447 = vmatprep.subr.mxu1 %v873_v16 }
  0xe2   : > { %1448 = vmatpush3.msra.mxu1 %v873_v16 }
  0xe3   : > { %1449 = vmatprep.subr.mxu1 %v872_v17 }
  0xe4   : > { %1450 = vmatpush3.msra.mxu1 %v872_v17 }
  0xe5   : > { %1451 = vmatprep.subr.mxu1 %v871_v18 }
  0xe6   : > { %1452 = vmatpush3.msra.mxu1 %v871_v18 }
  0xe7   : > { %1453 = vmatprep.subr.mxu1 %v870_v19 }
  0xe8   : > { %1454 = vmatpush3.msra.mxu1 %v870_v19 }
  0xe9   : > { %1455 = vmatprep.subr.mxu1 %v869_v20 }
  0xea   : > { %1456 = vmatpush3.msra.mxu1 %v869_v20 }
  0xeb   : > { %1457 = vmatprep.subr.mxu1 %v868_v21 }
  0xec   : > { %1458 = vmatpush3.msra.mxu1 %v868_v21 }
 0x19d   : > { %v1437_v23 = vpop.f32.mrf.mxu1 }
 0x19e   : > { %v648_v25 = vadd.f32 %v1442_v22, %v1437_v23 }
 0x19f   : > { %v558_v27 = vpop.f32.mrf.mxu1 }
 0x1a0   : > { %v1661_v28 = vadd.f32 %v1357_v24, %v648_v25  ;;  %v643_v29 = vadd.f32 %v642_v26, %v558_v27 }
 0x1a2   : > { %v764_v30 = vand.u32 2147483647, %v1661_v28  ;;  %v767_v31 = vand.u32 2139095040, %v1661_v28  ;;  %v1665_v32 = vadd.f32 %v1357_v24, %v643_v29  ;;  %vm766_vm1 = vcmp.lt.s32.totalorder %v1661_v28, 0 }
 0x1a4   : > { %v768_v33 = vshrl.u32 %v767_v31, 23  ;;  %v771_v34 = vand.u32 8388607, %v764_v30  ;;  %v663_v35 = vand.u32 2139095040, %v1665_v32  ;;  %v660_v41 = vand.u32 2147483647, %v1665_v32 }
 0x1a6   : > { %v1362_v36 = vadd.s32 4294967169, %v768_v33  ;;  %v664_v37 = vshrl.u32 %v663_v35, 23  ;;  %v772_v39 = vor.u32 8388608, %v771_v34  ;;  %v1675_v47 = vand.u32 8388607, %v660_v41 }
 0x1a8   : > { %v774_v38 = vadd.s32 1, %v1362_v36  ;;  %v1358_v40 = vadd.s32 4294967169, %v664_v37  ;;  %v1671_v46 = vshll.u32 %v772_v39, 8  ;;  %v668_v35 = vor.u32 8388608, %v1675_v47 }
 0x1aa   : > { %vm775_vm2 = vcmp.gt.s32.totalorder %v774_v38, 0  ;;  %v670_v43 = vadd.s32 1, %v1358_v40 }
 0x1ab   : > { %v776_v42 = vsel %vm775_vm2, %v774_v38, 0  ;;  %vm1747_vm2 = vcmp.le.f32.partialorder %v764_v30, 0.7853982 }
 0x1ac   : > { %v777_v44 = vshrl.u32 %v776_v42, 5  ;;  %v778_v45 = vand.u32 31, %v776_v42  ;;  %vm671_vm3 = vcmp.gt.s32.totalorder %v670_v43, 0 }
 0x1ad   : > { %v672_v5 = vsel %vm671_vm3, %v670_v43, 0  ;;  %vm662_vm3 = vcmp.lt.s32.totalorder %v1665_v32, 0 }
 0x1ae   : > { %v779_v48 = vsub.s32 32, %v778_v45  ;;  %v781_v50 = vshll.u32 %v1535_v49, %v778_v45  ;;  %v784_v52 = vshll.u32 %v1536_v51, %v778_v45  ;;  %v787_v54 = vshll.u32 %v1537_v53, %v778_v45 }
 0x1af   : > { %v790_v56 = vshll.u32 %v1538_v55, %v778_v45  ;;  %v793_v58 = vshll.u32 %v1539_v57, %v778_v45  ;;  %vm796_vm4 = vcmp.lt.s32.totalorder %v777_v44, 1  ;;  %vm797_vm5 = vcmp.lt.s32.totalorder %v777_v44, 2 }
 0x1b0   : > { %v782_v59 = vshrl.u32 %v1536_v51, %v779_v48  ;;  %v785_v60 = vshrl.u32 %v1537_v53, %v779_v48  ;;  %v788_v61 = vshrl.u32 %v1538_v55, %v779_v48  ;;  %v780_v62 = vshrl.u32 %v1535_v49, %v779_v48 }
 0x1b1   : > { %v791_v63 = vshrl.u32 %v1539_v57, %v779_v48  ;;  %v794_v1 = vshrl.u32 %v1540_v0, %v779_v48  ;;  %vm798_vm6 = vcmp.lt.s32.totalorder %v777_v44, 3  ;;  %vm799_vm7 = vcmp.lt.s32.totalorder %v777_v44, 4 }
 0x1b2   : > { %v783_v2 = vor.u32 %v782_v59, %v781_v50  ;;  %v786_v3 = vor.u32 %v785_v60, %v784_v52  ;;  %v789_v4 = vor.u32 %v788_v61, %v787_v54  ;;  %v674_v8 = vand.u32 31, %v672_v5 }
 0x1b3   : > { %v792_v6 = vor.u32 %v791_v63, %v790_v56  ;;  %v795_v7 = vor.u32 %v794_v1, %v793_v58  ;;  %v673_v20 = vshrl.u32 %v672_v5, 5  ;;  %v708_v61 = vshll.u32 %v668_v35, 8 }
 0x1b4   : > { %v800_v9 = vsel %vm796_vm4, %v780_v62, %v783_v2  ;;  %v801_v10 = vsel %vm799_vm7, %v789_v4, 2102212464  ;;  %v804_v11 = vsel %vm796_vm4, %v783_v2, %v786_v3  ;;  %v808_v12 = vsel %vm796_vm4, %v786_v3, %v789_v4 }
 0x1b5   : > { %v802_v13 = vsel %vm798_vm6, %v786_v3, %v801_v10  ;;  %v805_v14 = vsel %vm799_vm7, %v792_v6, 920167782  ;;  %v809_v15 = vsel %vm799_vm7, %v795_v7, 1326507024  ;;  %v675_v16 = vsub.s32 32, %v674_v8 }
 0x1b6   : > { %v803_v17 = vsel %vm797_vm5, %v800_v9, %v802_v13  ;;  %v806_v18 = vsel %vm798_vm6, %v789_v4, %v805_v14  ;;  %v810_v19 = vsel %vm798_vm6, %v792_v6, %v809_v15  ;;  %v686_v23 = vshll.u32 %v1538_v55, %v674_v8 }
 0x1b7   : > { %v807_v21 = vsel %vm797_vm5, %v804_v11, %v806_v18  ;;  %v811_v22 = vsel %vm797_vm5, %v808_v12, %v810_v19  ;;  %v687_v24 = vshrl.u32 %v1539_v57, %v675_v16  ;;  %v689_v31 = vshll.u32 %v1539_v57, %v674_v8 }
 0x1b8   : > { %v1701_v25 = vmul.u32.u64.low %v1671_v46, %v811_v22  ;;  %v1702_v26 = vmul.u32.u64.high %v1671_v46, %v811_v22, %v1701_v25  ;;  %v1705_v27 = vmul.u32.u64.low %v1671_v46, %v807_v21  ;;  %v1706_v29 = vmul.u32.u64.high %v1671_v46, %v807_v21, %v1705_v27 }
 0x1b9   : > { %v690_v33 = vshrl.u32 %v1540_v0, %v675_v16  ;;  %v688_v34 = vor.u32 %v687_v24, %v686_v23  ;;  %v677_v36 = vshll.u32 %v1535_v49, %v674_v8  ;;  %v678_v37 = vshrl.u32 %v1536_v51, %v675_v16 }
 0x1ba   : > { %v819_v38 = vmul.u32 %v1671_v46, %v803_v17  ;;  %v680_v40 = vshll.u32 %v1536_v51, %v674_v8  ;;  %v681_v42 = vshrl.u32 %v1537_v53, %v675_v16  ;;  %vm821_vm8 = vc.u32 %v1702_v26, %v1705_v27 }
 0x1bb   : > { %v691_v39 = vor.u32 %v690_v33, %v689_v31  ;;  %v822_v43 = vadd.s32 1, %v1706_v29  ;;  %vm695_vm9 = vcmp.lt.s32.totalorder %v673_v20, 4  ;;  %v679_v44 = vor.u32 %v678_v37, %v677_v36 }
 0x1bc   : > { %v682_v47 = vor.u32 %v681_v42, %v680_v40  ;;  %v683_v48 = vshll.u32 %v1537_v53, %v674_v8  ;;  %v684_v50 = vshrl.u32 %v1538_v55, %v675_v16  ;;  %v701_v52 = vsel %vm695_vm9, %v688_v34, 920167782 }
 0x1bd   : > { %v705_v45 = vsel %vm695_vm9, %v691_v39, 1326507024  ;;  %v823_v46 = vsel %vm821_vm8, %v822_v43, %v1706_v29  ;;  %vm692_vm10 = vcmp.lt.s32.totalorder %v673_v20, 1  ;;  %vm694_vm11 = vcmp.lt.s32.totalorder %v673_v20, 3 }
 0x1be   : > { %v824_v54 = vadd.s32 %v823_v46, %v819_v38  ;;  %v685_v56 = vor.u32 %v684_v50, %v683_v48  ;;  %v700_v58 = vsel %vm692_vm10, %v679_v44, %v682_v47  ;;  %v706_v59 = vsel %vm694_vm11, %v688_v34, %v705_v45 }
 0x1bf   : > { %v676_v60 = vshrl.u32 %v1535_v49, %v675_v16  ;;  %vm693_vm12 = vcmp.lt.s32.totalorder %v673_v20, 2  ;;  %v820_v31 = vadd.s32 %v1705_v27, %v1702_v26  ;;  %vm661_vm4 = vcmp.le.f32.partialorder %v660_v41, 0.7853982 }
 0x1c0   : > { %v825_v62 = vadd.s32 536870912, %v824_v54  ;;  %v697_v63 = vsel %vm695_vm9, %v685_v56, 2102212464  ;;  %v702_v1 = vsel %vm694_vm11, %v685_v56, %v701_v52  ;;  %v704_v2 = vsel %vm692_vm10, %v682_v47, %v685_v56 }
 0x1c1   : > { %v696_v3 = vsel %vm692_vm10, %v676_v60, %v679_v44  ;;  %v703_v4 = vsel %vm693_vm12, %v700_v58, %v702_v1  ;;  %v707_v5 = vsel %vm693_vm12, %v704_v2, %v706_v59  ;;  %v698_v7 = vsel %vm694_vm11, %v682_v47, %v697_v63 }
 0x1c2   : > { %v1727_v6 = vshrl.u32 %v825_v62, 30  ;;  %v1730_v8 = vmul.u32.u64.low %v708_v61, %v707_v5  ;;  %v1731_v9 = vmul.u32.u64.high %v708_v61, %v707_v5, %v1730_v8  ;;  %v699_v13 = vsel %vm693_vm12, %v696_v3, %v698_v7 }
 0x1c3   : > { %v1733_v10 = vmul.u32.u64.low %v708_v61, %v703_v4  ;;  %v1734_v11 = vmul.u32.u64.high %v708_v61, %v703_v4, %v1733_v10  ;;  %v715_v17 = vmul.u32 %v708_v61, %v699_v13  ;;  %vm883_vm11 = vcmask 523264  }
 0x1c4   : > { %v827_v12 = vshll.u32 %v1727_v6, 30  ;;  %v850_v8 = vsub.s32 4, %v1727_v6  ;;  %vm752_vm12 = vweird.f32 %v1665_v32 }
 0x1c5   : > { %vm717_vm13 = vc.u32 %v1731_v9, %v1733_v10  ;;  %v718_v15 = vadd.s32 1, %v1734_v11  ;;  %v716_v26 = vadd.s32 %v1733_v10, %v1731_v9 }
 0x1c6   : > { %v828_v14 = vsub.s32 %v824_v54, %v827_v12  ;;  %v851_v12 = vsel %vm766_vm1, %v850_v8, %v1727_v6 }
 0x1c7   : > { %v719_v18 = vsel %vm717_vm13, %v718_v15, %v1734_v11  ;;  %vm856_vm13 = vweird.f32 %v1661_v28 }
 0x1c8   : > { %v830_v16 = vsub.s32 0, %v828_v14  ;;  %v720_v20 = vadd.s32 %v719_v18, %v715_v17 }
 0x1ca   : > { %v1363_v19 = vmin.u32 %v830_v16, %v828_v14  ;;  %v721_v22 = vadd.s32 536870912, %v720_v20 }
 0x1cc   : > { %v832_v21 = vclz %v1363_v19  ;;  %v722_v24 = vshrl.u32 %v721_v22, 30 }
 0x1ce   : > { %v1364_v23 = vadd.s32 4294967294, %v832_v21  ;;  %v723_v25 = vshll.u32 %v722_v24, 30  ;;  %v746_v10 = vsub.s32 4, %v722_v24 }
 0x1d0   : > { %vm1365_vm14 = vcmp.lt.s32.totalorder %v1364_v23, 0  ;;  %v724_v35 = vsub.s32 %v720_v20, %v723_v25  ;;  %v747_v13 = vsel %vm662_vm3, %v746_v10, %v722_v24 }
 0x1d1   : > { %v835_v29 = vsel %vm1365_vm14, 0, %v1364_v23  ;;  %v749_v15 = vsel %vm661_vm4, 0, %v747_v13 }
 0x1d2   : > { %v836_v33 = vsub.s32 32, %v835_v29  ;;  %v840_v34 = vsub.s32 4294967266, %v835_v29  ;;  %v837_v36 = vshll.u32 %v828_v14, %v835_v29  ;;  %v726_v39 = vsub.s32 0, %v724_v35 }
 0x1d3   : > { %v853_v14 = vsel %vm1747_vm2, 0, %v851_v12  ;;  %v753_v19 = vadd.s32 3, %v749_v15 }
 0x1d4   : > { %v838_v37 = vshrl.u32 %v820_v31, %v836_v33  ;;  %v841_v38 = vadd.s32 127, %v840_v34  ;;  %v1359_v43 = vmin.u32 %v726_v39, %v724_v35  ;;  %v857_v16 = vadd.s32 3, %v853_v14  ;;  %v1180_v39 = vld [vmem:[%s1914_s8 + $0x38] sm:$0xff] }
 0x1d5   : > { %v754_v22 = vand.u32 3, %v753_v19  ;;  %1462 = vmatprep.subr.mxu0 %v1180_v39 }
 0x1d6   : > { %v839_v40 = vor.u32 %v838_v37, %v837_v36  ;;  %v842_v42 = vshll.u32 %v841_v38, 23  ;;  %v728_v45 = vclz %v1359_v43  ;;  %v858_v20 = vand.u32 3, %v857_v16  ;;  %1463 = vmatpush3.msra.mxu0 %v1180_v39  ;;  %v1175_v43 = vld [vmem:[%s1914_s8 + $0x10] sm:$0xff] }
 0x1d7   : > { %vm759_vm7 = vcmp.eq.s32.totalorder %v754_v22, 2  ;;  %vm756_vm8 = vcmp.eq.s32.totalorder %v754_v22, 0  ;;  %vm755_vm10 = vcmp.lt.s32.totalorder %v754_v22, 2 }
 0x1d8   : > { %v843_v44 = vor.u32 4788187, %v842_v42  ;;  %v846_v48 = vcvt.s32.f32 %v839_v40  ;;  %v1360_v50 = vadd.s32 4294967294, %v728_v45  ;;  %vm860_vm5 = vcmp.eq.s32.totalorder %v858_v20, 0  ;;  %v1179_v40 = vld [vmem:[%s1914_s8 + $0x30] sm:$0xff]  ;;  %v1176_v42 = vld [vmem:[%s1914_s8 + $0x18] sm:$0xff] }
 0x1d9   : > { %vm863_vm6 = vcmp.eq.s32.totalorder %v858_v20, 2  ;;  %vm859_vm9 = vcmp.lt.s32.totalorder %v858_v20, 2  ;;  %1464 = vmatprep.subr.mxu0 %v1179_v40  ;;  %v1173_v45 = vld [vmem:[%s1914_s8] sm:$0xff] }
 0x1da   : > { %v844_v47 = vand.u32 2147483647, %v843_v44  ;;  %vm1361_vm15 = vcmp.lt.s32.totalorder %v1360_v50, 0  ;;  %1465 = vmatpush3.msra.mxu0 %v1179_v40  ;;  %v1174_v44 = vld [vmem:[%s1914_s8 + $0x8] sm:$0xff] }
 0x1db   : > { %v731_v52 = vsel %vm1361_vm15, 0, %v1360_v50 }
 0x1dc   : > { %v847_v46 = vmul.f32 %v846_v48, %v844_v47  ;;  %v732_v27 = vsub.s32 32, %v731_v52  ;;  %v736_v56 = vsub.s32 4294967266, %v731_v52  ;;  %v733_v58 = vshll.u32 %v724_v35, %v731_v52  ;;  %v1366_v47 = vld [vmem:[%s1913_s7] ss:$0 sm:$0xff] }
 0x1de   : > { %v848_v54 = vxor.u32 2147483648, %v847_v46  ;;  %v734_v59 = vshrl.u32 %v716_v26, %v732_v27  ;;  %v737_v60 = vadd.s32 127, %v736_v56 }
 0x1e0   : > { %v849_v61 = vsel %vm766_vm1, %v848_v54, %v847_v46  ;;  %v735_v62 = vor.u32 %v734_v59, %v733_v58  ;;  %v738_v63 = vshll.u32 %v737_v60, 23 }
 0x1e1   : > { %v852_v2 = vsel %vm1747_vm2, %v1661_v28, %v849_v61  ;;  %v1177_v28 = vld [vmem:[%s1914_s8 + $0x20] sm:$0xff] }
 0x1e2   : > { %v739_v3 = vor.u32 4788187, %v738_v63  ;;  %v742_v5 = vcvt.s32.f32 %v735_v62  ;;  %1511 = vcosq.f32 %v852_v2 }
 0x1e3   : > { %1513 = vsinq.f32 %v852_v2 }
 0x1e4   : > { %v740_v4 = vand.u32 2147483647, %v739_v3 }
 0x1e6   : > { %v743_v7 = vmul.f32 %v742_v5, %v740_v4 }
 0x1e8   : > { %v744_v9 = vxor.u32 2147483648, %v743_v7 }
 0x1ea   : > { %v745_v30 = vsel %vm662_vm3, %v744_v9, %v743_v7 }
 0x1eb   : > { %v748_v11 = vsel %vm661_vm4, %v1665_v32, %v745_v30  ;;  %v1178_v32 = vld [vmem:[%s1914_s8 + $0x28] sm:$0xff] }
 0x1ec   : > { %1515 = vcosq.f32 %v748_v11  ;;  %1466 = vmatprep.subr.mxu0 %v1178_v32 }
 0x1ed   : > { %1517 = vsinq.f32 %v748_v11  ;;  %1467 = vmatpush3.msra.mxu0 %v1178_v32 }
 0x1ee   : > { %1468 = vmatprep.subr.mxu0 %v1177_v28 }
 0x1ef   : > { %v1512_v17 = vpop.eup %1511  ;;  %1469 = vmatpush3.msra.mxu0 %v1177_v28 }
 0x1f0   : > { %v1514_v18 = vpop.eup %1513  ;;  %v864_v21 = vxor.u32 2147483648, %v1512_v17  ;;  %1470 = vmatprep.subr.mxu0 %v1176_v42 }
 0x1f1   : > { %v861_v41 = vxor.u32 2147483648, %v1514_v18  ;;  %1471 = vmatpush3.msra.mxu0 %v1176_v42 }
 0x1f2   : > { %v865_v24 = vsel %vm863_vm6, %v864_v21, %v1514_v18  ;;  %1472 = vmatprep.subr.mxu0 %v1175_v43 }
 0x1f3   : > { %v862_v29 = vsel %vm860_vm5, %v1512_v17, %v861_v41  ;;  %1473 = vmatpush3.msra.mxu0 %v1175_v43 }
 0x1f4   : > { %v866_v35 = vsel %vm859_vm9, %v862_v29, %v865_v24  ;;  %1474 = vmatprep.subr.mxu0 %v1174_v44 }
 0x1f5   : > { %v867_v38 = vsel %vm856_vm13, nan, %v866_v35  ;;  %1475 = vmatpush3.msra.mxu0 %v1174_v44 }
 0x1f6   : > { %1476 = vmatprep.subr.mxu0 %v1173_v45 }
 0x1f7   : > { %1477 = vmatpush3.msra.mxu0 %v1173_v45 }
 0x1f9   : > { %v1516_v23 = vpop.eup %1515 }
 0x1fa   : > { %v1518_v25 = vpop.eup %1517  ;;  %v760_v6 = vxor.u32 2147483648, %v1516_v23 }
 0x1fb   : > { %v757_v31 = vxor.u32 2147483648, %v1518_v25 }
 0x1fc   : > { %v761_v33 = vsel %vm759_vm7, %v760_v6, %v1518_v25 }
 0x1fd   : > { %v758_v34 = vsel %vm756_vm8, %v1516_v23, %v757_v31 }
 0x1fe   : > { %v762_v36 = vsel %vm755_vm10, %v758_v34, %v761_v33 }
 0x1ff   : > { %v763_v37 = vsel %vm752_vm12, nan, %v762_v36 }
 0x200   : > { %1459 = vmatprep.mubr.msk.f32.mxu1 %vm883_vm11, %v763_v37 }
 0x201   : > { %1460 = vmatmul.mubr.msk.f32.vlgmr.msra.gmra.mxu1 %vm883_vm11, %v867_v38 }
 0x2c1   : > { %v1461_v48 = vpop.f32.mrf.mxu1 }
 0x2c2   : > { %v1795_v50 = vadd.f32 %v1461_v48, %v1366_v47 }
 0x2c3   : > { %v956_v46 = vpop.f32.mrf.mxu1 }
 0x2c4   : > { %v1069_v52 = vand.u32 2147483647, %v1795_v50  ;;  %v1072_v54 = vand.u32 2139095040, %v1795_v50  ;;  %v1799_v26 = vadd.f32 %v1366_v47, %v956_v46 }
 0x2c6   : > { %v1073_v27 = vshrl.u32 %v1072_v54, 23  ;;  %v1076_v56 = vand.u32 8388607, %v1069_v52  ;;  %v968_v58 = vand.u32 2139095040, %v1799_v26  ;;  %v965_v60 = vand.u32 2147483647, %v1799_v26 }
 0x2c8   : > { %v1373_v59 = vadd.s32 4294967169, %v1073_v27  ;;  %v969_v61 = vshrl.u32 %v968_v58, 23  ;;  %v1077_v63 = vor.u32 8388608, %v1076_v56  ;;  %v972_v2 = vand.u32 8388607, %v965_v60 }
 0x2ca   : > { %v1079_v62 = vadd.s32 1, %v1373_v59  ;;  %v1369_v1 = vadd.s32 4294967169, %v969_v61  ;;  %v1807_v8 = vshll.u32 %v1077_v63, 8  ;;  %v973_v30 = vor.u32 8388608, %v972_v2 }
 0x2cc   : > { %vm1080_vm14 = vcmp.gt.s32.totalorder %v1079_v62, 0  ;;  %v975_v4 = vadd.s32 1, %v1369_v1  ;;  %v1013_v32 = vshll.u32 %v973_v30, 8 }
 0x2cd   : > { %v1081_v3 = vsel %vm1080_vm14, %v1079_v62, 0  ;;  %vm1071_vm14 = vcmp.lt.s32.totalorder %v1795_v50, 0 }
 0x2ce   : > { %v1082_v5 = vshrl.u32 %v1081_v3, 5  ;;  %v1083_v7 = vand.u32 31, %v1081_v3  ;;  %vm976_vm15 = vcmp.gt.s32.totalorder %v975_v4, 0 }
 0x2cf   : > { %v977_v23 = vsel %vm976_vm15, %v975_v4, 0  ;;  %vm1872_vm15 = vcmp.le.f32.partialorder %v1069_v52, 0.7853982 }
 0x2d0   : > { %v1084_v9 = vsub.s32 32, %v1083_v7  ;;  %v1086_v10 = vshll.u32 %v1535_v49, %v1083_v7  ;;  %v1089_v11 = vshll.u32 %v1536_v51, %v1083_v7  ;;  %v1092_v12 = vshll.u32 %v1537_v53, %v1083_v7 }
 0x2d1   : > { %v1095_v13 = vshll.u32 %v1538_v55, %v1083_v7  ;;  %v1098_v14 = vshll.u32 %v1539_v57, %v1083_v7  ;;  %vm1101_vm1 = vcmp.lt.s32.totalorder %v1082_v5, 1  ;;  %vm1103_vm2 = vcmp.lt.s32.totalorder %v1082_v5, 3 }
 0x2d2   : > { %v1087_v15 = vshrl.u32 %v1536_v51, %v1084_v9  ;;  %v1090_v16 = vshrl.u32 %v1537_v53, %v1084_v9  ;;  %v1093_v17 = vshrl.u32 %v1538_v55, %v1084_v9  ;;  %v1085_v18 = vshrl.u32 %v1535_v49, %v1084_v9 }
 0x2d3   : > { %v1096_v19 = vshrl.u32 %v1539_v57, %v1084_v9  ;;  %v1099_v20 = vshrl.u32 %v1540_v0, %v1084_v9  ;;  %vm1104_vm3 = vcmp.lt.s32.totalorder %v1082_v5, 4  ;;  %v979_v29 = vand.u32 31, %v977_v23 }
 0x2d4   : > { %v1088_v41 = vor.u32 %v1087_v15, %v1086_v10  ;;  %v1091_v21 = vor.u32 %v1090_v16, %v1089_v11  ;;  %v1094_v22 = vor.u32 %v1093_v17, %v1092_v12  ;;  %vm1102_vm4 = vcmp.lt.s32.totalorder %v1082_v5, 2 }
 0x2d5   : > { %v1097_v25 = vor.u32 %v1096_v19, %v1095_v13  ;;  %v1100_v6 = vor.u32 %v1099_v20, %v1098_v14  ;;  %v980_v38 = vsub.s32 32, %v979_v29  ;;  %v978_v44 = vshrl.u32 %v977_v23, 5 }
 0x2d6   : > { %v1105_v24 = vsel %vm1101_vm1, %v1085_v18, %v1088_v41  ;;  %v1106_v31 = vsel %vm1104_vm3, %v1094_v22, 2102212464  ;;  %v1109_v33 = vsel %vm1101_vm1, %v1088_v41, %v1091_v21  ;;  %v1113_v34 = vsel %vm1101_vm1, %v1091_v21, %v1094_v22 }
 0x2d7   : > { %v1107_v35 = vsel %vm1103_vm2, %v1091_v21, %v1106_v31  ;;  %v1110_v36 = vsel %vm1104_vm3, %v1097_v25, 920167782  ;;  %v1114_v37 = vsel %vm1104_vm3, %v1100_v6, 1326507024  ;;  %v982_v54 = vshll.u32 %v1535_v49, %v979_v29 }
 0x2d8   : > { %v1111_v39 = vsel %vm1103_vm2, %v1094_v22, %v1110_v36  ;;  %v1115_v40 = vsel %vm1103_vm2, %v1097_v25, %v1114_v37  ;;  %v1108_v28 = vsel %vm1102_vm4, %v1105_v24, %v1107_v35  ;;  %v983_v27 = vshrl.u32 %v1536_v51, %v980_v38 }
 0x2d9   : > { %v1112_v42 = vsel %vm1102_vm4, %v1109_v33, %v1111_v39  ;;  %v1116_v43 = vsel %vm1102_vm4, %v1113_v34, %v1115_v40  ;;  %v985_v56 = vshll.u32 %v1536_v51, %v979_v29  ;;  %v986_v58 = vshrl.u32 %v1537_v53, %v980_v38 }
 0x2da   : > { %v1828_v45 = vmul.u32.u64.low %v1807_v8, %v1116_v43  ;;  %v1829_v47 = vmul.u32.u64.high %v1807_v8, %v1116_v43, %v1828_v45  ;;  %v1832_v48 = vmul.u32.u64.low %v1807_v8, %v1112_v42  ;;  %v1833_v46 = vmul.u32.u64.high %v1807_v8, %v1112_v42, %v1832_v48 }
 0x2db   : > { %v988_v59 = vshll.u32 %v1537_v53, %v979_v29  ;;  %v989_v61 = vshrl.u32 %v1538_v55, %v980_v38  ;;  %v991_v62 = vshll.u32 %v1538_v55, %v979_v29  ;;  %v992_v63 = vshrl.u32 %v1539_v57, %v980_v38 }
 0x2dc   : > { %v984_v1 = vor.u32 %v983_v27, %v982_v54  ;;  %v987_v2 = vor.u32 %v986_v58, %v985_v56  ;;  %v994_v3 = vshll.u32 %v1539_v57, %v979_v29  ;;  %v995_v4 = vshrl.u32 %v1540_v0, %v980_v38 }
 0x2dd   : > { %v1124_v5 = vmul.u32 %v1807_v8, %v1108_v28  ;;  %vm1126_vm5 = vc.u32 %v1829_v47, %v1832_v48  ;;  %v1127_v51 = vadd.s32 1, %v1833_v46  ;;  %v990_v53 = vor.u32 %v989_v61, %v988_v59 }
 0x2de   : > { %v981_v7 = vshrl.u32 %v1535_v49, %v980_v38  ;;  %v993_v9 = vor.u32 %v992_v63, %v991_v62  ;;  %v996_v55 = vor.u32 %v995_v4, %v994_v3  ;;  %vm997_vm6 = vcmp.lt.s32.totalorder %v978_v44, 1 }
 0x2df   : > { %v1128_v10 = vsel %vm1126_vm5, %v1127_v51, %v1833_v46  ;;  %vm999_vm7 = vcmp.lt.s32.totalorder %v978_v44, 3  ;;  %vm1000_vm8 = vcmp.lt.s32.totalorder %v978_v44, 4  ;;  %v1005_v57 = vsel %vm997_vm6, %v984_v1, %v987_v2 }
 0x2e0   : > { %v1129_v30 = vadd.s32 %v1128_v10, %v1124_v5  ;;  %v1002_v0 = vsel %vm1000_vm8, %v990_v53, 2102212464  ;;  %v1006_v11 = vsel %vm1000_vm8, %v993_v9, 920167782  ;;  %v1009_v8 = vsel %vm997_vm6, %v987_v2, %v990_v53 }
 0x2e1   : > { %vm998_vm9 = vcmp.lt.s32.totalorder %v978_v44, 2  ;;  %v1001_v12 = vsel %vm997_vm6, %v981_v7, %v984_v1  ;;  %v1007_v13 = vsel %vm999_vm7, %v990_v53, %v1006_v11  ;;  %v1010_v14 = vsel %vm1000_vm8, %v996_v55, 1326507024 }
 0x2e2   : > { %v1130_v15 = vadd.s32 536870912, %v1129_v30  ;;  %v1003_v16 = vsel %vm999_vm7, %v987_v2, %v1002_v0  ;;  %v1008_v17 = vsel %vm998_vm9, %v1005_v57, %v1007_v13  ;;  %v1011_v49 = vsel %vm999_vm7, %v993_v9, %v1010_v14 }
 0x2e3   : > { %v1012_v18 = vsel %vm998_vm9, %v1009_v8, %v1011_v49  ;;  %v1852_v19 = vmul.u32.u64.low %v1013_v32, %v1008_v17  ;;  %v1853_v20 = vmul.u32.u64.high %v1013_v32, %v1008_v17, %v1852_v19  ;;  %v1004_v23 = vsel %vm998_vm9, %v1001_v12, %v1003_v16 }
 0x2e4   : > { %v1855_v41 = vshrl.u32 %v1130_v15, 30  ;;  %v1857_v21 = vmul.u32.u64.low %v1013_v32, %v1012_v18  ;;  %v1858_v22 = vmul.u32.u64.high %v1013_v32, %v1012_v18, %v1857_v21  ;;  %v1020_v24 = vmul.u32 %v1013_v32, %v1004_v23 }
 0x2e5   : > { %v1023_v6 = vadd.s32 1, %v1853_v20  ;;  %v1125_v43 = vadd.s32 %v1832_v48, %v1829_v47  ;;  %vm967_vm1 = vcmp.lt.s32.totalorder %v1799_v26, 0  ;;  %vm966_vm2 = vcmp.le.f32.partialorder %v965_v60, 0.7853982 }
 0x2e6   : > { %v1132_v25 = vshll.u32 %v1855_v41, 30  ;;  %vm1022_vm10 = vc.u32 %v1858_v22, %v1852_v19  ;;  %v1021_v5 = vadd.s32 %v1852_v19, %v1858_v22  ;;  %v1155_v14 = vsub.s32 4, %v1855_v41 }
 0x2e7   : > { %v1024_v31 = vsel %vm1022_vm10, %v1023_v6, %v1853_v20  ;;  %vm1057_vm9 = vweird.f32 %v1799_v26  ;;  %vm1161_vm10 = vweird.f32 %v1795_v50 }
 0x2e8   : > { %v1133_v29 = vsub.s32 %v1129_v30, %v1132_v25  ;;  %v1025_v34 = vadd.s32 %v1024_v31, %v1020_v24  ;;  %v1156_v49 = vsel %vm1071_vm14, %v1155_v14, %v1855_v41 }
 0x2e9   : > { %v1158_v19 = vsel %vm1872_vm15, 0, %v1156_v49 }
 0x2ea   : > { %v1135_v33 = vsub.s32 0, %v1133_v29  ;;  %v1026_v36 = vadd.s32 536870912, %v1025_v34  ;;  %v1162_v21 = vadd.s32 3, %v1158_v19 }
 0x2ec   : > { %v1374_v35 = vmin.u32 %v1135_v33, %v1133_v29  ;;  %v1027_v38 = vshrl.u32 %v1026_v36, 30  ;;  %v1163_v6 = vand.u32 3, %v1162_v21 }
 0x2ee   : > { %v1137_v37 = vclz %v1374_v35  ;;  %v1028_v40 = vshll.u32 %v1027_v38, 30  ;;  %v1051_v16 = vsub.s32 4, %v1027_v38  ;;  %vm1165_vm3 = vcmp.eq.s32.totalorder %v1163_v6, 0 }
 0x2ef   : > { %vm1168_vm4 = vcmp.eq.s32.totalorder %v1163_v6, 2  ;;  %vm1164_vm7 = vcmp.lt.s32.totalorder %v1163_v6, 2 }
 0x2f0   : > { %v1375_v39 = vadd.s32 4294967294, %v1137_v37  ;;  %v1029_v28 = vsub.s32 %v1025_v34, %v1028_v40  ;;  %v1052_v18 = vsel %vm967_vm1, %v1051_v16, %v1027_v38 }
 0x2f1   : > { %v1054_v20 = vsel %vm966_vm2, 0, %v1052_v18 }
 0x2f2   : > { %vm1376_vm12 = vcmp.lt.s32.totalorder %v1375_v39, 0  ;;  %v1031_v45 = vsub.s32 0, %v1029_v28  ;;  %v1058_v25 = vadd.s32 3, %v1054_v20 }
 0x2f3   : > { %v1140_v42 = vsel %vm1376_vm12, 0, %v1375_v39 }
 0x2f4   : > { %v1141_v44 = vsub.s32 32, %v1140_v42  ;;  %v1145_v32 = vsub.s32 4294967266, %v1140_v42  ;;  %v1142_v46 = vshll.u32 %v1133_v29, %v1140_v42  ;;  %v1370_v56 = vmin.u32 %v1031_v45, %v1029_v28 }
 0x2f5   : > { %v1059_v24 = vand.u32 3, %v1058_v25 }
 0x2f6   : > { %v1143_v54 = vshrl.u32 %v1125_v43, %v1141_v44  ;;  %v1146_v27 = vadd.s32 127, %v1145_v32  ;;  %v1033_v61 = vclz %v1370_v56  ;;  %v1377_v43 = vld [vmem:[%s1915_s9] ss:$0 sm:$0xff] }
 0x2f7   : > { %vm1064_vm5 = vcmp.eq.s32.totalorder %v1059_v24, 2  ;;  %vm1061_vm6 = vcmp.eq.s32.totalorder %v1059_v24, 0  ;;  %vm1060_vm8 = vcmp.lt.s32.totalorder %v1059_v24, 2 }
 0x2f8   : > { %v1144_v58 = vor.u32 %v1143_v54, %v1142_v46  ;;  %v1147_v59 = vshll.u32 %v1146_v27, 23  ;;  %v1371_v63 = vadd.s32 4294967294, %v1033_v61 }
 0x2fa   : > { %v1148_v62 = vor.u32 4788187, %v1147_v59  ;;  %v1151_v2 = vcvt.s32.f32 %v1144_v58  ;;  %vm1372_vm13 = vcmp.lt.s32.totalorder %v1371_v63, 0 }
 0x2fb   : > { %v1036_v3 = vsel %vm1372_vm13, 0, %v1371_v63 }
 0x2fc   : > { %v1149_v1 = vand.u32 2147483647, %v1148_v62  ;;  %v1037_v47 = vsub.s32 32, %v1036_v3  ;;  %v1041_v48 = vsub.s32 4294967266, %v1036_v3  ;;  %v1038_v53 = vshll.u32 %v1029_v28, %v1036_v3 }
 0x2fe   : > { %v1152_v4 = vmul.f32 %v1151_v2, %v1149_v1  ;;  %v1039_v7 = vshrl.u32 %v1021_v5, %v1037_v47  ;;  %v1042_v9 = vadd.s32 127, %v1041_v48 }
 0x300   : > { %v1153_v51 = vxor.u32 2147483648, %v1152_v4  ;;  %v1040_v10 = vor.u32 %v1039_v7, %v1038_v53  ;;  %v1043_v57 = vshll.u32 %v1042_v9, 23 }
 0x302   : > { %v1154_v55 = vsel %vm1071_vm14, %v1153_v51, %v1152_v4  ;;  %v1044_v11 = vor.u32 4788187, %v1043_v57  ;;  %v1047_v12 = vcvt.s32.f32 %v1040_v10 }
 0x303   : > { %v1157_v0 = vsel %vm1872_vm15, %v1795_v50, %v1154_v55 }
 0x304   : > { %v1045_v8 = vand.u32 2147483647, %v1044_v11  ;;  %1519 = vcosq.f32 %v1157_v0 }
 0x305   : > { %1521 = vsinq.f32 %v1157_v0 }
 0x306   : > { %v1048_v13 = vmul.f32 %v1047_v12, %v1045_v8 }
 0x308   : > { %v1049_v15 = vxor.u32 2147483648, %v1048_v13 }
 0x30a   : > { %v1050_v52 = vsel %vm967_vm1, %v1049_v15, %v1048_v13 }
 0x30b   : > { %v1053_v17 = vsel %vm966_vm2, %v1799_v26, %v1050_v52 }
 0x30c   : > { %1523 = vcosq.f32 %v1053_v17 }
 0x30d   : > { %1525 = vsinq.f32 %v1053_v17 }
 0x311   : > { %v1520_v22 = vpop.eup %1519 }
 0x312   : > { %v1522_v23 = vpop.eup %1521  ;;  %v1169_v29 = vxor.u32 2147483648, %v1520_v22 }
 0x313   : > { %v1166_v60 = vxor.u32 2147483648, %v1522_v23 }
 0x314   : > { %v1170_v35 = vsel %vm1168_vm4, %v1169_v29, %v1522_v23 }
 0x315   : > { %v1167_v34 = vsel %vm1165_vm3, %v1520_v22, %v1166_v60 }
 0x316   : > { %v1171_v39 = vsel %vm1164_vm7, %v1167_v34, %v1170_v35 }
 0x317   : > { %v1172_v42 = vsel %vm1161_vm10, nan, %v1171_v39 }
 0x319   : > { %v1524_v31 = vpop.eup %1523 }
 0x31a   : > { %v1526_v33 = vpop.eup %1525  ;;  %v1065_v41 = vxor.u32 2147483648, %v1524_v31 }
 0x31b   : > { %v1062_v36 = vxor.u32 2147483648, %v1526_v33 }
 0x31c   : > { %v1066_v37 = vsel %vm1064_vm5, %v1065_v41, %v1526_v33 }
 0x31d   : > { %v1063_v38 = vsel %vm1061_vm6, %v1524_v31, %v1062_v36 }
 0x31e   : > { %v1067_v40 = vsel %vm1060_vm8, %v1063_v38, %v1066_v37 }
 0x31f   : > { %v1068_v28 = vsel %vm1057_vm9, nan, %v1067_v40 }
 0x320   : > { %1478 = vmatprep.mubr.msk.f32.mxu0 %vm883_vm11, %v1068_v28 }
 0x321   : > { %1479 = vmatmul.mubr.msk.f32.vlgmr.msra.gmra.mxu0 %vm883_vm11, %v1172_v42 }
 0x3e1   : > { %v1480_v44 = vpop.f32.mrf.mxu0 }
 0x3e2   : > { %v1266_v26 = vadd.f32 %v1480_v44, %v1377_v43 }
 0x3e3   : > { %v1260_v32 = vpop.f32.mrf.mxu0 }
 0x3e4   : > { %1270 = vst.msk [vmem:[%s379_s19 + $0x8] sm:$0xff] %vm385_vm0, %v1266_v26  ;;  %v1261_v50 = vadd.f32 %v1377_v43, %v1260_v32 }
 0x3e6   : > { %1269 = vst.msk [vmem:[%s379_s19] sm:$0xff] %vm385_vm0, %v1261_v50 }
 0x3e7 PF: > { %s20_s13 = sadd.s32 1, %s1533_s13  }
 0x3e8   : > { %p17_p4 = scmp.ge.s32.totalorder %s20_s13, 4  }
 0x3ea   :  { %19 = sbr.rel (!%p17_p4) target bundleno = 1 (0x1), region = 93 }

</bundles_post_ra>
